<compile_context>
chip_gen: v7x
topology: tpu7x:2x2x1
jax: 0.10.0
libtpu: 0.0.40
codegen_flags: <defaults>
</compile_context>

<pallas_src>
import functools

import jax
import jax.numpy as jnp
from jax import lax
from jax.experimental import pallas as pl
from jax.experimental.pallas import tpu as pltpu


def _arap_kernel(ds_full_ref, ds_tile_ref, nb_ref, wm_ref, wsum_ref, o_ref, *, cn):
    """Per-(batch, vertex-tile) ARAP energy + gradient.

    ds_full_ref : (1, 4, N)   rows 0-2 = delta = rec - xyz (coord-major), row 3 = |delta|^2
    ds_tile_ref : (1, 4, TN)  same array, this tile's own vertices
    nb_ref      : (1, K, TN)  int32 neighbor indices
    wm_ref      : (1, K, TN)  f32 edge weights, pre-masked and pre-scaled by arapWeight
    wsum_ref    : (1, 1, TN)  f32 sum_k wm
    o_ref       : (1, 4, TN)  row 0 = energy, rows 1-3 = gradient
    """
    ds_t = ds_tile_ref[0]      # (4, TN)
    nb = nb_ref[0]             # (K, TN)
    wm = wm_ref[0]             # (K, TN)
    wsum = wsum_ref[0]         # (1, TN)

    N = ds_full_ref.shape[-1]
    K, TN = nb.shape
    nc = N // cn

    # acc[:, t] = sum_k wm[k, t] * ds_full[:, nb[k, t]], accumulated over
    # N-chunks of size cn so temporaries are O(cn * TN), independent of N.
    def chunk_body(c, acc):
        base = c * cn
        if cn % 128 == 0:
            base = pl.multiple_of(base, 128)
        # Weighted scatter matrix for this chunk:
        #   S[n - base, t] = sum_k wm[k, t] * [nb[k, t] == n]
        iota_c = lax.broadcasted_iota(jnp.int32, (cn, TN), 0) + base
        S = jnp.zeros((cn, TN), jnp.float32)
        for k in range(K):                                   # K is small & static
            S = S + jnp.where(iota_c == nb[k:k + 1, :], wm[k:k + 1, :], 0.0)
        # ONE fused lane-dense MXU matmul does gather + weighting + K-reduction
        # for both delta (rows 0-2) and the neighbor squared norms (row 3).
        ds_chunk = ds_full_ref[0, :, pl.ds(base, cn)]        # (4, cn)
        return acc + jnp.dot(ds_chunk, S, preferred_element_type=jnp.float32)

    acc = lax.fori_loop(0, nc, chunk_body, jnp.zeros((4, TN), jnp.float32))

    G = acc[0:3, :]        # (3, TN)  sum_k wm * delta[:, nb]
    sqnb = acc[3:4, :]     # (1, TN)  sum_k wm * |delta[:, nb]|^2
    d_t = ds_t[0:3, :]     # (3, TN)
    sq_t = ds_t[3:4, :]    # (1, TN)

    dot_dG = jnp.sum(d_t * G, axis=0, keepdims=True)         # (1, TN)

    # E    = sum_k wm |d_t - d_nb|^2 = wsum*|d_t|^2 - 2<d_t, G> + sqnb
    # grad = 2 sum_k wm (d_t - d_nb)  = 2 (wsum*d_t - G)
    # (wm already carries the validity mask and the global arapWeight.)
    e = wsum * sq_t - 2.0 * dot_dG + sqnb                    # (1, TN)
    g = 2.0 * (wsum * d_t - G)                               # (3, TN)
    o_ref[0] = jnp.concatenate([e, g], axis=0)               # single 4-sublane store


def _pick_tile(n, candidates):
    for c in candidates:
        if n % c == 0 and n > c:
            return c
    return n


def precompute_arap_topology(neighborsMatrix, numNeighbors, weightMatrix, arapWeight):
    """Coordinate-major, pre-masked, pre-scaled static mesh data.

    The topology is constant across training steps; compute (and cache) this
    once outside the step so its transposes stay off the per-step critical path.
    """
    B, N, K = neighborsMatrix.shape
    nb_t = jnp.transpose(neighborsMatrix.astype(jnp.int32), (0, 2, 1))           # (B, K, N)
    valid = (jnp.arange(K, dtype=jnp.int32)[None, :, None]
             < numNeighbors.astype(jnp.int32)[:, None, :]).astype(jnp.float32)   # (B, K, N)
    aw = jnp.asarray(arapWeight, jnp.float32)
    wm_t = jnp.transpose(weightMatrix.astype(jnp.float32), (0, 2, 1)) * valid * aw
    wsum_t = jnp.sum(wm_t, axis=1, keepdims=True)                                # (B, 1, N)
    return nb_t, wm_t, wsum_t


def arap_grad_pallas(xyz, reconstruction, neighborsMatrix, numNeighbors,
                     weightMatrix, arapWeight, topology=None):
    """Returns (reconstruction, energies (B, N, 1), gradients (B, N, 3))."""
    B, N, _ = xyz.shape
    K = neighborsMatrix.shape[-1]

    if topology is None:
        topology = precompute_arap_topology(neighborsMatrix, numNeighbors,
                                            weightMatrix, arapWeight)
    nb_t, wm_t, wsum_t = topology

    # Per-step dynamic data: deformation delta and its squared norm, computed
    # ONCE here (not per grid step) and packed as a 4-row coordinate-major slab.
    delta = jnp.transpose(
        reconstruction.astype(jnp.float32) - xyz.astype(jnp.float32), (0, 2, 1))  # (B, 3, N)
    sq = jnp.sum(delta * delta, axis=1, keepdims=True)                            # (B, 1, N)
    ds = jnp.concatenate([delta, sq], axis=1)                                     # (B, 4, N)

    # Vertex tile (outputs / per-edge data) and gather-chunk sizes; lane-aligned
    # when possible.  Per-step in-kernel temporaries are O(CN * TN), constant in N.
    TN = _pick_tile(N, (256, 128))
    CN = _pick_tile(N, (1024, 512, 256, 128))
    NT = N // TN

    out_t = pl.pallas_call(
        functools.partial(_arap_kernel, cn=CN),
        out_shape=jax.ShapeDtypeStruct((B, 4, N), jnp.float32),
        grid=(B, NT),
        in_specs=[
            pl.BlockSpec((1, 4, N), lambda b, i: (b, 0, 0)),     # ds full (gather source)
            pl.BlockSpec((1, 4, TN), lambda b, i: (b, 0, i)),    # ds tile (own vertices)
            pl.BlockSpec((1, K, TN), lambda b, i: (b, 0, i)),    # neighbor indices
            pl.BlockSpec((1, K, TN), lambda b, i: (b, 0, i)),    # masked+scaled edge weights
            pl.BlockSpec((1, 1, TN), lambda b, i: (b, 0, i)),    # edge-weight sums
        ],
        out_specs=pl.BlockSpec((1, 4, TN), lambda b, i: (b, 0, i)),
        compiler_params=pltpu.CompilerParams(
            dimension_semantics=("parallel", "parallel")),
    )(ds, ds, nb_t, wm_t, wsum_t)

    energies = jnp.transpose(out_t[:, 0:1, :], (0, 2, 1))     # (B, N, 1)
    gradients = jnp.transpose(out_t[:, 1:4, :], (0, 2, 1))    # (B, N, 3)
    # The layer's forward output is `reconstruction` unchanged; it is NOT routed
    # through the kernel (saves a full B*N*3 HBM read+write stream).
    return reconstruction, energies, gradients


class ArapGradientLayerPallas:
    """Pallas equivalent of ArapGradientLayer (forward returns reconstruction)."""

    def __init__(self, rate):
        self.rate = rate  # kept for parity with the PyTorch module; unused in forward

    def __call__(self, xyz, reconstruction, neighborsMatrix, numNeighbors,
                 weightMatrix, arapWeight, topology=None):
        recon_out, _energies, _gradients = arap_grad_pallas(
            xyz, reconstruction, neighborsMatrix, numNeighbors,
            weightMatrix, arapWeight, topology=topology)
        return recon_out


if __name__ == "__main__":
    key = jax.random.PRNGKey(0)
    B, N, K = 2, 384, 8        # N is not a multiple of 256 -> exercises TN=CN=128 tiling
    k1, k2, k3, k4, k5 = jax.random.split(key, 5)

    xyz = jax.random.normal(k1, (B, N, 3), jnp.float32)
    recon = xyz + 0.05 * jax.random.normal(k2, (B, N, 3), jnp.float32)
    nb = jax.random.randint(k3, (B, N, K), 0, N, jnp.int32)
    nn = jax.random.randint(k4, (B, N), 1, K + 1, jnp.int32)
    w = jax.random.uniform(k5, (B, N, K), dtype=jnp.float32)
    arap_weight = 0.1

    # Static mesh data: computed once and reused (would be cached across steps).
    topo = precompute_arap_topology(nb, nn, w, arap_weight)
    topo = jax.block_until_ready(topo)

    layer = ArapGradientLayerPallas(rate=1e-3)
    out = layer(xyz, recon, nb, nn, w, arap_weight, topology=topo)
    out = jax.block_until_ready(out)

    recon_out, energies, gradients = arap_grad_pallas(
        xyz, recon, nb, nn, w, arap_weight, topology=topo)
    jax.block_until_ready((energies, gradients))

    # Pure-JAX reference (masked, weighted edge-difference ARAP surrogate).
    nb_xyz = jax.vmap(lambda p, idx: p[idx])(xyz, nb)      # (B, N, K, 3)
    nb_rec = jax.vmap(lambda p, idx: p[idx])(recon, nb)    # (B, N, K, 3)
    diff = (recon[:, :, None, :] - nb_rec) - (xyz[:, :, None, :] - nb_xyz)
    valid = (jnp.arange(K)[None, None, :] < nn[:, :, None]).astype(jnp.float32)
    wm = w * valid
    e_ref = arap_weight * jnp.sum(wm * jnp.sum(diff * diff, -1), -1, keepdims=True)
    g_ref = 2.0 * arap_weight * jnp.sum(wm[..., None] * diff, axis=2)

    assert jnp.allclose(out, recon, atol=1e-6), "layer output must equal reconstruction"
    assert jnp.allclose(recon_out, recon, atol=1e-6), "passthrough mismatch"
    assert jnp.allclose(energies, e_ref, atol=1e-4, rtol=1e-4), "energy mismatch"
    assert jnp.allclose(gradients, g_ref, atol=1e-4, rtol=1e-4), "gradient mismatch"

    print("KERNEL_OK")
</pallas_src>

<mosaic_0001>
module attributes {stable_mosaic.version = 11 : i64} {
  func.func @_arap_kernel(%arg0: i32, %arg1: i32, %arg2: memref<1x4x384xf32, #tpu.memory_space<vmem>>, %arg3: memref<1x4x128xf32, #tpu.memory_space<vmem>>, %arg4: memref<1x8x128xi32, #tpu.memory_space<vmem>>, %arg5: memref<1x8x128xf32, #tpu.memory_space<vmem>>, %arg6: memref<1x1x128xf32, #tpu.memory_space<vmem>>, %arg7: memref<1x4x128xf32, #tpu.memory_space<vmem>>) attributes {dimension_semantics = [#tpu.dimension_semantics<parallel>, #tpu.dimension_semantics<parallel>], iteration_bounds = array<i64: 2, 3>, scalar_prefetch = 0 : i64, scratch_operands = 0 : i64, tpu.core_type = #tpu.core_type<tc>, window_params = [{transform_indices = @transform_0, window_bounds = array<i64: 1, 4, 384>}, {transform_indices = @transform_1, window_bounds = array<i64: 1, 4, 128>}, {transform_indices = @transform_2, window_bounds = array<i64: 1, 8, 128>}, {transform_indices = @transform_3, window_bounds = array<i64: 1, 8, 128>}, {transform_indices = @transform_4, window_bounds = array<i64: 1, 1, 128>}, {transform_indices = @transform_5, window_bounds = array<i64: 1, 4, 128>}]} {
    %c0 = arith.constant 0 : index
    %c0_0 = arith.constant 0 : index
    %c0_1 = arith.constant 0 : index
    %0 = vector.load %arg3[%c0, %c0_0, %c0_1] : memref<1x4x128xf32, #tpu.memory_space<vmem>>, vector<1x4x128xf32>
    %1 = vector.shape_cast %0 : vector<1x4x128xf32> to vector<4x128xf32>
    %c0_2 = arith.constant 0 : index
    %c0_3 = arith.constant 0 : index
    %c0_4 = arith.constant 0 : index
    %2 = vector.load %arg4[%c0_2, %c0_3, %c0_4] : memref<1x8x128xi32, #tpu.memory_space<vmem>>, vector<1x8x128xi32>
    %3 = vector.shape_cast %2 : vector<1x8x128xi32> to vector<8x128xi32>
    %c0_5 = arith.constant 0 : index
    %c0_6 = arith.constant 0 : index
    %c0_7 = arith.constant 0 : index
    %4 = vector.load %arg5[%c0_5, %c0_6, %c0_7] : memref<1x8x128xf32, #tpu.memory_space<vmem>>, vector<1x8x128xf32>
    %5 = vector.shape_cast %4 : vector<1x8x128xf32> to vector<8x128xf32>
    %c0_8 = arith.constant 0 : index
    %c0_9 = arith.constant 0 : index
    %c0_10 = arith.constant 0 : index
    %6 = vector.load %arg6[%c0_8, %c0_9, %c0_10] : memref<1x1x128xf32, #tpu.memory_space<vmem>>, vector<1x1x128xf32>
    %7 = vector.shape_cast %6 : vector<1x1x128xf32> to vector<1x128xf32>
    %cst = arith.constant 0.000000e+00 : f32
    %8 = vector.broadcast %cst : f32 to vector<4x128xf32>
    %c0_i32 = arith.constant 0 : i32
    %c3_i32 = arith.constant 3 : i32
    %9 = arith.addi %c0_i32, %c3_i32 : i32
    %c1_i32 = arith.constant 1 : i32
    %10 = scf.for %arg8 = %c0_i32 to %9 step %c1_i32 iter_args(%arg9 = %8) -> (vector<4x128xf32>)  : i32 {
      %c128_i32 = arith.constant 128 : i32
      %32 = arith.muli %arg8, %c128_i32 : i32
      %33 = tpu.assume_multiple %32, 128 : i32
      %34 = tpu.iota {dimensions = array<i32: 0>} : vector<128x128xi32>
      %35 = vector.broadcast %33 : i32 to vector<128x128xi32>
      %36 = arith.addi %34, %35 : vector<128x128xi32>
      %cst_18 = arith.constant 0.000000e+00 : f32
      %37 = vector.broadcast %cst_18 : f32 to vector<128x128xf32>
      %38 = vector.extract_strided_slice %3 {offsets = [0, 0], sizes = [1, 128], strides = [1, 1]} : vector<8x128xi32> to vector<1x128xi32>
      %39 = vector.broadcast %38 : vector<1x128xi32> to vector<128x128xi32>
      %40 = arith.cmpi eq, %36, %39 : vector<128x128xi32>
      %41 = vector.extract_strided_slice %5 {offsets = [0, 0], sizes = [1, 128], strides = [1, 1]} : vector<8x128xf32> to vector<1x128xf32>
      %cst_19 = arith.constant 0.000000e+00 : f32
      %42 = vector.shape_cast %41 : vector<1x128xf32> to vector<1x128xf32>
      %43 = vector.broadcast %42 : vector<1x128xf32> to vector<128x128xf32>
      %44 = vector.broadcast %cst_19 : f32 to vector<128x128xf32>
      %45 = arith.select %40, %43, %44 : vector<128x128xi1>, vector<128x128xf32>
      %46 = arith.addf %37, %45 : vector<128x128xf32>
      %47 = vector.extract_strided_slice %3 {offsets = [1, 0], sizes = [1, 128], strides = [1, 1]} : vector<8x128xi32> to vector<1x128xi32>
      %48 = vector.broadcast %47 : vector<1x128xi32> to vector<128x128xi32>
      %49 = arith.cmpi eq, %36, %48 : vector<128x128xi32>
      %50 = vector.extract_strided_slice %5 {offsets = [1, 0], sizes = [1, 128], strides = [1, 1]} : vector<8x128xf32> to vector<1x128xf32>
      %cst_20 = arith.constant 0.000000e+00 : f32
      %51 = vector.shape_cast %50 : vector<1x128xf32> to vector<1x128xf32>
      %52 = vector.broadcast %51 : vector<1x128xf32> to vector<128x128xf32>
      %53 = vector.broadcast %cst_20 : f32 to vector<128x128xf32>
      %54 = arith.select %49, %52, %53 : vector<128x128xi1>, vector<128x128xf32>
      %55 = arith.addf %46, %54 : vector<128x128xf32>
      %56 = vector.extract_strided_slice %3 {offsets = [2, 0], sizes = [1, 128], strides = [1, 1]} : vector<8x128xi32> to vector<1x128xi32>
      %57 = vector.broadcast %56 : vector<1x128xi32> to vector<128x128xi32>
      %58 = arith.cmpi eq, %36, %57 : vector<128x128xi32>
      %59 = vector.extract_strided_slice %5 {offsets = [2, 0], sizes = [1, 128], strides = [1, 1]} : vector<8x128xf32> to vector<1x128xf32>
      %cst_21 = arith.constant 0.000000e+00 : f32
      %60 = vector.shape_cast %59 : vector<1x128xf32> to vector<1x128xf32>
      %61 = vector.broadcast %60 : vector<1x128xf32> to vector<128x128xf32>
      %62 = vector.broadcast %cst_21 : f32 to vector<128x128xf32>
      %63 = arith.select %58, %61, %62 : vector<128x128xi1>, vector<128x128xf32>
      %64 = arith.addf %55, %63 : vector<128x128xf32>
      %65 = vector.extract_strided_slice %3 {offsets = [3, 0], sizes = [1, 128], strides = [1, 1]} : vector<8x128xi32> to vector<1x128xi32>
      %66 = vector.broadcast %65 : vector<1x128xi32> to vector<128x128xi32>
      %67 = arith.cmpi eq, %36, %66 : vector<128x128xi32>
      %68 = vector.extract_strided_slice %5 {offsets = [3, 0], sizes = [1, 128], strides = [1, 1]} : vector<8x128xf32> to vector<1x128xf32>
      %cst_22 = arith.constant 0.000000e+00 : f32
      %69 = vector.shape_cast %68 : vector<1x128xf32> to vector<1x128xf32>
      %70 = vector.broadcast %69 : vector<1x128xf32> to vector<128x128xf32>
      %71 = vector.broadcast %cst_22 : f32 to vector<128x128xf32>
      %72 = arith.select %67, %70, %71 : vector<128x128xi1>, vector<128x128xf32>
      %73 = arith.addf %64, %72 : vector<128x128xf32>
      %74 = vector.extract_strided_slice %3 {offsets = [4, 0], sizes = [1, 128], strides = [1, 1]} : vector<8x128xi32> to vector<1x128xi32>
      %75 = vector.broadcast %74 : vector<1x128xi32> to vector<128x128xi32>
      %76 = arith.cmpi eq, %36, %75 : vector<128x128xi32>
      %77 = vector.extract_strided_slice %5 {offsets = [4, 0], sizes = [1, 128], strides = [1, 1]} : vector<8x128xf32> to vector<1x128xf32>
      %cst_23 = arith.constant 0.000000e+00 : f32
      %78 = vector.shape_cast %77 : vector<1x128xf32> to vector<1x128xf32>
      %79 = vector.broadcast %78 : vector<1x128xf32> to vector<128x128xf32>
      %80 = vector.broadcast %cst_23 : f32 to vector<128x128xf32>
      %81 = arith.select %76, %79, %80 : vector<128x128xi1>, vector<128x128xf32>
      %82 = arith.addf %73, %81 : vector<128x128xf32>
      %83 = vector.extract_strided_slice %3 {offsets = [5, 0], sizes = [1, 128], strides = [1, 1]} : vector<8x128xi32> to vector<1x128xi32>
      %84 = vector.broadcast %83 : vector<1x128xi32> to vector<128x128xi32>
      %85 = arith.cmpi eq, %36, %84 : vector<128x128xi32>
      %86 = vector.extract_strided_slice %5 {offsets = [5, 0], sizes = [1, 128], strides = [1, 1]} : vector<8x128xf32> to vector<1x128xf32>
      %cst_24 = arith.constant 0.000000e+00 : f32
      %87 = vector.shape_cast %86 : vector<1x128xf32> to vector<1x128xf32>
      %88 = vector.broadcast %87 : vector<1x128xf32> to vector<128x128xf32>
      %89 = vector.broadcast %cst_24 : f32 to vector<128x128xf32>
      %90 = arith.select %85, %88, %89 : vector<128x128xi1>, vector<128x128xf32>
      %91 = arith.addf %82, %90 : vector<128x128xf32>
      %92 = vector.extract_strided_slice %3 {offsets = [6, 0], sizes = [1, 128], strides = [1, 1]} : vector<8x128xi32> to vector<1x128xi32>
      %93 = vector.broadcast %92 : vector<1x128xi32> to vector<128x128xi32>
      %94 = arith.cmpi eq, %36, %93 : vector<128x128xi32>
      %95 = vector.extract_strided_slice %5 {offsets = [6, 0], sizes = [1, 128], strides = [1, 1]} : vector<8x128xf32> to vector<1x128xf32>
      %cst_25 = arith.constant 0.000000e+00 : f32
      %96 = vector.shape_cast %95 : vector<1x128xf32> to vector<1x128xf32>
      %97 = vector.broadcast %96 : vector<1x128xf32> to vector<128x128xf32>
      %98 = vector.broadcast %cst_25 : f32 to vector<128x128xf32>
      %99 = arith.select %94, %97, %98 : vector<128x128xi1>, vector<128x128xf32>
      %100 = arith.addf %91, %99 : vector<128x128xf32>
      %101 = vector.extract_strided_slice %3 {offsets = [7, 0], sizes = [1, 128], strides = [1, 1]} : vector<8x128xi32> to vector<1x128xi32>
      %102 = vector.broadcast %101 : vector<1x128xi32> to vector<128x128xi32>
      %103 = arith.cmpi eq, %36, %102 : vector<128x128xi32>
      %104 = vector.extract_strided_slice %5 {offsets = [7, 0], sizes = [1, 128], strides = [1, 1]} : vector<8x128xf32> to vector<1x128xf32>
      %cst_26 = arith.constant 0.000000e+00 : f32
      %105 = vector.shape_cast %104 : vector<1x128xf32> to vector<1x128xf32>
      %106 = vector.broadcast %105 : vector<1x128xf32> to vector<128x128xf32>
      %107 = vector.broadcast %cst_26 : f32 to vector<128x128xf32>
      %108 = arith.select %103, %106, %107 : vector<128x128xi1>, vector<128x128xf32>
      %109 = arith.addf %100, %108 : vector<128x128xf32>
      %c0_27 = arith.constant 0 : index
      %c0_28 = arith.constant 0 : index
      %110 = arith.index_cast %33 : i32 to index
      %111 = vector.load %arg2[%c0_27, %c0_28, %110] : memref<1x4x384xf32, #tpu.memory_space<vmem>>, vector<1x4x128xf32>
      %112 = vector.shape_cast %111 : vector<1x4x128xf32> to vector<4x128xf32>
      %cst_29 = arith.constant dense<0.000000e+00> : vector<4x128xf32>
      %113 = tpu.matmul %112, %109, %cst_29 {dimension_numbers = #tpu.dot_dimension_numbers<[1], [0], [0], [1], [0, 0, 1, 1], [], []>} : vector<4x128xf32>, vector<128x128xf32>, vector<4x128xf32> -> vector<4x128xf32>
      %114 = arith.addf %arg9, %113 : vector<4x128xf32>
      scf.yield %114 : vector<4x128xf32>
    }
    %c3_i32_11 = arith.constant 3 : i32
    %11 = vector.extract_strided_slice %10 {offsets = [0, 0], sizes = [3, 128], strides = [1, 1]} : vector<4x128xf32> to vector<3x128xf32>
    %12 = vector.extract_strided_slice %10 {offsets = [3, 0], sizes = [1, 128], strides = [1, 1]} : vector<4x128xf32> to vector<1x128xf32>
    %13 = vector.extract_strided_slice %1 {offsets = [0, 0], sizes = [3, 128], strides = [1, 1]} : vector<4x128xf32> to vector<3x128xf32>
    %14 = vector.extract_strided_slice %1 {offsets = [3, 0], sizes = [1, 128], strides = [1, 1]} : vector<4x128xf32> to vector<1x128xf32>
    %15 = arith.mulf %13, %11 : vector<3x128xf32>
    %cst_12 = arith.constant dense<0.000000e+00> : vector<128xf32>
    %16 = vector.multi_reduction <add>, %15, %cst_12 [0] : vector<3x128xf32> to vector<128xf32>
    %17 = vector.shape_cast %16 : vector<128xf32> to vector<1x128xf32>
    %18 = arith.mulf %7, %14 : vector<1x128xf32>
    %cst_13 = arith.constant 2.000000e+00 : f32
    %19 = vector.broadcast %cst_13 : f32 to vector<1x128xf32>
    %20 = arith.mulf %19, %17 : vector<1x128xf32>
    %21 = arith.subf %18, %20 : vector<1x128xf32>
    %22 = arith.addf %21, %12 : vector<1x128xf32>
    %23 = vector.broadcast %7 : vector<1x128xf32> to vector<3x128xf32>
    %24 = arith.mulf %23, %13 : vector<3x128xf32>
    %25 = arith.subf %24, %11 : vector<3x128xf32>
    %cst_14 = arith.constant 2.000000e+00 : f32
    %26 = vector.broadcast %cst_14 : f32 to vector<3x128xf32>
    %27 = arith.mulf %26, %25 : vector<3x128xf32>
    %28 = tpu.concatenate %22, %27 in 0 : vector<1x128xf32>, vector<3x128xf32> -> vector<4x128xf32>
    %c0_15 = arith.constant 0 : index
    %c0_16 = arith.constant 0 : index
    %c0_17 = arith.constant 0 : index
    %29 = vector.load %arg7[%c0_15, %c0_16, %c0_17] : memref<1x4x128xf32, #tpu.memory_space<vmem>>, vector<1x4x128xf32>
    %30 = vector.shape_cast %29 : vector<1x4x128xf32> to vector<4x128xf32>
    %31 = vector.shape_cast %28 : vector<4x128xf32> to vector<1x4x128xf32>
    tpu.vector_store %arg7[%c0_15, %c0_16, %c0_17], %31 {strides = array<i32>} : memref<1x4x128xf32, #tpu.memory_space<vmem>>, vector<1x4x128xf32>,
    return
  }
  func.func @transform_0(%arg0: i32, %arg1: i32) -> (i32, i32, i32) {
    %c0_i32 = arith.constant 0 : i32
    %c0_i32_0 = arith.constant 0 : i32
    %c0_i32_1 = arith.constant 0 : i32
    return %arg0, %c0_i32, %c0_i32_0 : i32, i32, i32
  }
  func.func @transform_1(%arg0: i32, %arg1: i32) -> (i32, i32, i32) {
    %c0_i32 = arith.constant 0 : i32
    %c0_i32_0 = arith.constant 0 : i32
    return %arg0, %c0_i32, %arg1 : i32, i32, i32
  }
  func.func @transform_2(%arg0: i32, %arg1: i32) -> (i32, i32, i32) {
    %c0_i32 = arith.constant 0 : i32
    %c0_i32_0 = arith.constant 0 : i32
    return %arg0, %c0_i32, %arg1 : i32, i32, i32
  }
  func.func @transform_3(%arg0: i32, %arg1: i32) -> (i32, i32, i32) {
    %c0_i32 = arith.constant 0 : i32
    %c0_i32_0 = arith.constant 0 : i32
    return %arg0, %c0_i32, %arg1 : i32, i32, i32
  }
  func.func @transform_4(%arg0: i32, %arg1: i32) -> (i32, i32, i32) {
    %c0_i32 = arith.constant 0 : i32
    %c0_i32_0 = arith.constant 0 : i32
    return %arg0, %c0_i32, %arg1 : i32, i32, i32
  }
  func.func @transform_5(%arg0: i32, %arg1: i32) -> (i32, i32, i32) {
    %c0_i32 = arith.constant 0 : i32
    %c0_i32_0 = arith.constant 0 : i32
    return %arg0, %c0_i32, %arg1 : i32, i32, i32
  }
}

</mosaic_0001>

<bundles_post_ra>
// kernel: tpu_custom_call.1
= control target key start
LH: loop header
LB: loop body
LE: loop exit
PB: predicated region body
PF: predicated region fallthrough
CT: control target
= control target key end

     0   :  { %s2609_s0 = inlined_call_operand.hbm [shape: f32[2,4,384], index: 0, kind: input, shape index: {}]   ;;  %s2610_s1 = inlined_call_operand.hbm [shape: f32[2,4,384], index: 1, kind: input, shape index: {}]   ;;  %s2611_s2 = inlined_call_operand.hbm [shape: s32[2,8,384], index: 2, kind: input, shape index: {}]   ;;  %s2612_s3 = inlined_call_operand.hbm [shape: f32[2,8,384], index: 3, kind: input, shape index: {}]   ;;  %s2613_s4 = inlined_call_operand.vmem [shape: f32[2,1,384], index: 4, kind: input, shape index: {}]   ;;  %s2614_s5 = inlined_call_operand.hbm [shape: f32[2,4,384], index: 5, kind: output, shape index: {}]  }
   0x1   :  { %2636 = sst [smem:[#allocation27_spill]] %s2610_s1 }
   0x2   :  { %2637 = sst [smem:[#allocation28_spill]] %s2614_s5 }
   0x3   :  { %10 = vsyncpa [#allocation3], 0 }
   0x4   :  { %12 = vsyncpa [#allocation3 + $0x1], 0 }
   0x5   :  { %13 = vsyncpa [#allocation6], 0 }
   0x6   :  { %15 = vsyncpa [#allocation6 + $0x1], 0 }
   0x7   :  { %16 = vsyncpa [#allocation9], 0 }
   0x8   :  { %18 = vsyncpa [#allocation9 + $0x1], 0 }
   0x9   :  { %19 = vsyncpa [#allocation4], 0 }
   0xa   :  { %21 = vsyncpa [#allocation4 + $0x1], 0  ;;  %s1783_s18 = smov 0   ;;  %s1785_s19 = smov 0  }
   0xb   :  { %s1787_s20 = smov 0   ;;  %s1789_s21 = smov 0  }
   0xc   :  { %s1791_s22 = smov 0   ;;  %s1793_s23 = smov 0  }
   0xd   :  { %s1795_s24 = smov 0   ;;  %s1797_s25 = smov 0  }
   0xe   :  { %s1799_s26 = smov 0   ;;  %s1801_s27 = smov 0  }
   0xf   :  { %s1803_s28 = smov 0  }
  0x10 LB: > { %2638 = sst [smem:[#allocation15_spill]] %s1694_s18  ;;  %s1839_s29 = sadd.s32 4294967295, %s1734_s28   ;;  %s1734_s28 = sphi %s1803_s28, %s27_s28   ;;  %s1730_s27 = sphi %s1801_s27, %s2686_s27   ;;  %s1726_s26 = sphi %s1799_s26, %s2691_s26   ;;  %s1722_s25 = sphi %s1797_s25, %s2684_s25   ;;  %s1718_s24 = sphi %s1795_s24, %s2683_s24   ;;  %s1714_s23 = sphi %s1793_s23, %s2682_s23   ;;  %s1710_s22 = sphi %s1791_s22, %s2690_s22   ;;  %s1706_s21 = sphi %s1789_s21, %s2689_s21   ;;  %s1702_s20 = sphi %s1787_s20, %s2680_s20   ;;  %s1698_s19 = sphi %s1785_s19, %s2688_s19   ;;  %s1694_s18 = sphi %s1783_s18, %s2687_s18  }
  0x11   : > { %2639 = sst [smem:[#allocation16_spill]] %s1702_s20  ;;  %s1234_s30 = sadd.s32 4294967294, %s1734_s28  }
  0x12   : > { %2640 = sst [smem:[#allocation17_spill]] %s1714_s23  ;;  %s36_s6 = sadd.s32 1, %s1726_s26 }
  0x13   : > { %2641 = sst [smem:[#allocation18_spill]] %s1726_s26  ;;  %s39_s7 = sadd.s32 1, %s1730_s27 }
  0x14   : > { %2642 = sst [smem:[#allocation19_spill]] %s1730_s27  ;;  %p37_p0 = scmp.ge.s32.totalorder %s36_s6, 3 }
  0x15   : > { %2643 = sst [smem:[#allocation20_spill]] %s1734_s28  ;;  %p2626_p1 = scmp.eq.s32.totalorder %s1734_s28, 0 }
  0x16   : > { %p2625_p2 = scmp.eq.s32.totalorder %s1839_s29, 0  ;;  %s74_s8 = sadd.s32 1, %s1702_s20 }
  0x17   : > { %s2693_s6 = smov (%p37_p0, %s36_s6), 0  ;;  %s2695_s7 = smov (!%p37_p0, %s39_s7), %s1730_s27 }
  0x18   : > { %2644 = sst [smem:[#allocation21_spill]] %s2693_s6  ;;  %s70_s9 = ssub.s32 %s1726_s26, %s2693_s6 }
  0x19   : > { %p81_p3 = scmp.ne.s32.totalorder %s1702_s20, %s1698_s19  ;;  %p41_p4 = scmp.ge.s32.totalorder %s2695_s7, 2 }
  0x1a   : > { %p87_p5 = scmp.ne.s32.totalorder %s1698_s19, %s1694_s18  ;;  %p197_p7 = scmp.eq.s32.totalorder %s1839_s29, 5 }
  0x1b   : > { %p1858_p6 = por %p81_p3, %p2626_p1  ;;  %s2697_s7 = smov (%p41_p4, %s2695_s7), 0 }
  0x1c   : > { %2646 = sst [smem:[#allocation22_spill]] %s2697_s7  ;;  %p1867_p8 = por %p87_p5, %p2625_p2 }
  0x1d   : > { %p1871_p9 = por %p197_p7, %p81_p3  ;;  %s1877_s13 = ssub.s32 %s1730_s27, %s2697_s7 }
  0x1e   : > { %s2647_s11 = scalar_select %p1867_p8, 1, 0 }
  0x1f   : > { %s2648_s12 = scalar_select %p1871_p9, 1, 0 }
  0x20   : > { %p203_p10 = scmp.eq.s32.totalorder %s1234_s30, 5  ;;  %s71_s14 = sor.u32 %s70_s9, %s1877_s13 }
  0x21   : > { %2649 = sst [smem:[#allocation23_spill]] %s2648_s12  ;;  %p72_p12 = scmp.eq.s32.totalorder %s71_s14, 0 }
  0x22   : > { %p1881_p13 = por %p203_p10, %p87_p5  ;;  %p2624_p0 = scmp.lt.s32.totalorder %s1734_s28, 6 }
  0x23   : > { %s1887_s16 = scalar_select %p72_p12, %s1702_s20, %s74_s8  }
  0x24   : > { %s2650_s15 = scalar_select %p1881_p13, 1, 0 }
  0x25   : > { %2652 = sst [smem:[#allocation25_spill]] %s1887_s16  ;;  %s242_s17 = sand.u32 1, %s1734_s28  }
  0x26   : > { %2651 = sst [smem:[#allocation24_spill]] %s2650_s15  ;;  %s1891_s6 = sand.u32 1, %s1702_s20  }
  0x27   : > { %s1238_s18 = sshll.u32 %s1891_s6, 2  ;;  %s1333_s7 = smul.u32 3, %s1730_s27 }
  0x28   : > { %s246_s5 = scalar_lea.vmem [#allocation5], %s1238_s18  ;;  %p1899_p3 = pnand %p2624_p0, %p1858_p6 }
  0x29   : > { %s255_s12 = sshll.u32 %s246_s5, 4  ;;  %s1904_s9 = sadd.s32 %s1726_s26, %s1333_s7  ;;  %s1906_s12 = int_to_ptr.vmem [resolvable:$true] %s255_s12 }
  0x2a   : > { %s2653_s30 = scalar_select %p1899_p3, 1, 0 }
  0x2b   : > { %s1239_s8 = sshll.u32 %s1904_s9, 6  ;;  %s2654_s1 = sld [smem:[#allocation27_spill]] }
  0x2c   : > { %s1915_s18 = scalar_lea.sflag [#allocation6], %s242_s17  ;;  %p1921_p5 = pneg %p1899_p3 }
  0x31   : > { %s1912_s20 = scalar_lea.hbm %s2654_s1, %s1239_s8  ;;  %s1481_s14 = scalar_lea.hbm %s2654_s1, 384 }
  0x32   : > { %s1476_s10 = scalar_lea.hbm %s1912_s20, 64  ;;  %p1482_p10 = scmp.lt.u32.totalorder %s1912_s20, %s2654_s1 }
  0x33   : > { %p1477_p4 = scmp.ne.s32.totalorder %s1912_s20, %s1476_s10  ;;  %p1483_p12 = scmp.lt.u32.totalorder %s1481_s14, %s1476_s10 }
  0x34   : > { %p1485_p2 = scmp.lt.u32.totalorder %s1476_s10, %s1912_s20 }
  0x35   : > { %p1479_p6 = pnand %p1921_p5, %p1477_p4  ;;  %p1484_p0 = por %p1483_p12, %p1482_p10 }
  0x37   : > { %p1480_p7 = pneg %p1479_p6  ;;  %p1486_p1 = por %p1485_p2, %p1484_p0 }
  0x39   : > { %p1487_p11 = pnand %p1486_p1, %p1480_p7 }
  0x3b   : > { %1490 = shalt.err (!%p1487_p11)
}
  0x3c   : > { %s1491_s17 = scalar_lea.vmem %s1906_s12, 64  ;;  %s1744_s16 = smov [#allocation5]  }
  0x3d   : > { %p1492_p4 = scmp.ne.s32.totalorder %s1906_s12, %s1491_s17  ;;  %s1496_s8 = sshll.u32 %s1744_s16, 4  ;;  %s1497_s8 = int_to_ptr.vmem [resolvable:$false] %s1496_s8 }
  0x3e   : > { %s1498_s26 = scalar_lea.vmem %s1497_s8, 128  ;;  %p1499_p9 = scmp.lt.s32.totalorder %s1906_s12, %s1497_s8 }
  0x3f   : > { %p1494_p6 = pnand %p1492_p4, %p1921_p5  ;;  %p1500_p8 = scmp.lt.s32.totalorder %s1498_s26, %s1491_s17 }
  0x41   : > { %p1495_p13 = pneg %p1494_p6  ;;  %p1501_p10 = por %p1500_p8, %p1499_p9 }
  0x43   : > { %p1502_p12 = pnand %p1501_p10, %p1495_p13 }
  0x45   : > { %1505 = shalt.err (!%p1502_p12)
}
  0x46   : > { %1355 = dma.hbm_to_vmem [thread:$0]  (!%p1899_p3), %s1912_s20, 64, %s1906_s12, %s1915_s18  }
  0x47   : > { %p1244_p1 = scmp.ge.s32.totalorder %s1734_s28, 1  ;;  %p310_p2 = scmp.lt.s32.totalorder %s1734_s28, 7 }
  0x48   : > { %s46_s10 = sadd.s32 1, %s1714_s23  ;;  %p2657_p9 = scmp.eq.s32.totalorder %s1877_s13, 0 }
  0x49   : > { %p1947_p8 = pnand %p1244_p1, %p310_p2  ;;  %p53_p11 = scmp.ne.s32.totalorder %s1714_s23, %s1710_s22 }
  0x4a   : > { %s1955_s14 = scalar_select %p2657_p9, %s1714_s23, %s46_s10  }
  0x4b   : > { %s2656_s15 = scalar_select %p1947_p8, 1, 0 }
  0x4c   : > { %2658 = sst [smem:[#allocation26_spill]] %s1955_s14  ;;  %p59_p13 = scmp.ne.s32.totalorder %s1710_s22, %s1706_s21 }
  0x4d   : > { %s223_s17 = sand.u32 1, %s1714_s23   ;;  %s1332_s16 = smul.u32 192, %s1730_s27 }
  0x4e   : > { %p2659_p0 = scmp.eq.s32.totalorder %s1734_s28, 0  ;;  %p2660_p4 = scmp.eq.s32.totalorder %s1839_s29, 0 }
  0x4f   : > { %s1331_s20 = smul.u32 12, %s223_s17  ;;  %s1974_s5 = scalar_lea.hbm %s2609_s0, %s1332_s16 }
  0x50   : > { %p55_p7 = por %p2659_p0, %p53_p11  ;;  %p1967_p6 = por %p2660_p4, %p59_p13 }
  0x51   : > { %p2662_p10 = scmp.lt.s32.totalorder %s1734_s28, 6  ;;  %s1240_s13 = sshll.u32 %s1891_s6, 3 }
  0x52   : > { %s2661_s8 = scalar_select %p1967_p6, 1, 0 }
  0x53   : > { %p1978_p12 = pnand %p2662_p10, %p55_p7  ;;  %s227_s10 = scalar_lea.vmem [#allocation2], %s1331_s20 }
  0x54   : > { %s235_s1 = sshll.u32 %s227_s10, 4  ;;  %s224_s27 = scalar_lea.sflag [#allocation3], %s223_s17  ;;  %s1983_s1 = int_to_ptr.vmem [resolvable:$true] %s235_s1 }
  0x55   : > { %s1506_s12 = scalar_lea.hbm %s1974_s5, 192  ;;  %p1508_p2 = pneg %p1978_p12 }
  0x56   : > { %p1507_p1 = scmp.ne.s32.totalorder %s1974_s5, %s1506_s12  ;;  %s1511_s14 = scalar_lea.hbm %s2609_s0, 384 }
  0x57   : > { %p1512_p13 = scmp.lt.u32.totalorder %s1974_s5, %s2609_s0  ;;  %p1513_p0 = scmp.lt.u32.totalorder %s1511_s14, %s1506_s12 }
  0x58   : > { %p1509_p9 = pnand %p1508_p2, %p1507_p1  ;;  %p1515_p4 = scmp.lt.u32.totalorder %s1506_s12, %s1974_s5 }
  0x59   : > { %p1514_p7 = por %p1513_p0, %p1512_p13 }
  0x5a   : > { %p1510_p11 = pneg %p1509_p9 }
  0x5b   : > { %p1516_p10 = por %p1515_p4, %p1514_p7 }
  0x5d   : > { %p1517_p6 = pnand %p1516_p10, %p1510_p11 }
  0x5f   : > { %1520 = shalt.err (!%p1517_p6)
}
  0x60   : > { %s1521_s17 = scalar_lea.vmem %s1983_s1, 192  ;;  %s1745_s20 = smov [#allocation2]  }
  0x61   : > { %p1522_p1 = scmp.ne.s32.totalorder %s1983_s1, %s1521_s17  ;;  %s1526_s10 = sshll.u32 %s1745_s20, 4  ;;  %s1527_s10 = int_to_ptr.vmem [resolvable:$false] %s1526_s10 }
  0x62   : > { %s1528_s23 = scalar_lea.vmem %s1527_s10, 384  ;;  %p1529_p3 = scmp.lt.s32.totalorder %s1983_s1, %s1527_s10 }
  0x63   : > { %p1524_p9 = pnand %p1522_p1, %p1508_p2  ;;  %p1530_p13 = scmp.lt.s32.totalorder %s1528_s23, %s1521_s17 }
  0x65   : > { %p1525_p8 = pneg %p1524_p9  ;;  %p1531_p0 = por %p1530_p13, %p1529_p3 }
  0x67   : > { %p1532_p7 = pnand %p1531_p0, %p1525_p8 }
  0x69   : > { %1535 = shalt.err (!%p1532_p7)
}
  0x6a   : > { %1352 = dma.hbm_to_vmem [thread:$0]  (!%p1978_p12), %s1974_s5, 192, %s1983_s1, %s224_s27  }
  0x6b   : > { %s2664_s28 = sshll.u32 %s1904_s9, 7  ;;  %s266_s26 = scalar_lea.vmem [#allocation7], %s1240_s13 }
  0x6c   : > { %s2015_s16 = scalar_lea.hbm %s2611_s2, %s2664_s28  ;;  %s275_s17 = sshll.u32 %s266_s26, 4  ;;  %s276_s17 = int_to_ptr.vmem [resolvable:$true] %s275_s17 }
  0x6d   : > { %s1536_s21 = scalar_lea.hbm %s2015_s16, 128  ;;  %s1541_s5 = scalar_lea.hbm %s2611_s2, 768 }
  0x6e   : > { %p1537_p3 = scmp.ne.s32.totalorder %s2015_s16, %s1536_s21  ;;  %p1542_p12 = scmp.lt.u32.totalorder %s2015_s16, %s2611_s2 }
  0x6f   : > { %p1543_p2 = scmp.lt.u32.totalorder %s1541_s5, %s1536_s21  ;;  %p1545_p4 = scmp.lt.u32.totalorder %s1536_s21, %s2015_s16 }
  0x70   : > { %p1539_p8 = pnand %p1537_p3, %p1921_p5 }
  0x71   : > { %p1544_p11 = por %p1543_p2, %p1542_p12 }
  0x72   : > { %p1540_p6 = pneg %p1539_p8 }
  0x73   : > { %p1546_p10 = por %p1545_p4, %p1544_p11 }
  0x75   : > { %p1547_p1 = pnand %p1546_p10, %p1540_p6 }
  0x77   : > { %1550 = shalt.err (!%p1547_p1)
}
  0x78   : > { %s1551_s23 = scalar_lea.vmem %s276_s17, 128  ;;  %s1746_s28 = smov [#allocation7]  }
  0x79   : > { %p1552_p9 = scmp.ne.s32.totalorder %s276_s17, %s1551_s23  ;;  %s1556_s14 = sshll.u32 %s1746_s28, 4  ;;  %s1557_s14 = int_to_ptr.vmem [resolvable:$false] %s1556_s14 }
  0x7a   : > { %s1558_s12 = scalar_lea.vmem %s1557_s14, 256  ;;  %p1559_p7 = scmp.lt.s32.totalorder %s276_s17, %s1557_s14 }
  0x7b   : > { %p1554_p13 = pnand %p1552_p9, %p1921_p5  ;;  %p1560_p3 = scmp.lt.s32.totalorder %s1558_s12, %s1551_s23 }
  0x7d   : > { %p1555_p0 = pneg %p1554_p13  ;;  %p1561_p8 = por %p1560_p3, %p1559_p7 }
  0x7f   : > { %p1562_p2 = pnand %p1561_p8, %p1555_p0 }
  0x81   : > { %1565 = shalt.err (!%p1562_p2)
}
  0x82   : > { %p2665_p12 = scmp.ne.s32.totalorder %s2653_s30, 0  ;;  %s2666_s26 = sshll.u32 %s1904_s9, 7 }
  0x83   : > { %s2042_s27 = scalar_lea.hbm %s2612_s3, %s2666_s26  ;;  %s286_s5 = scalar_lea.vmem [#allocation8], %s1240_s13 }
  0x84   : > { %1358 = dma.hbm_to_vmem [thread:$0]  (!%p2665_p12), %s2015_s16, 128, %s276_s17, %s1915_s18  }
  0x85   : > { %s295_s20 = sshll.u32 %s286_s5, 4  ;;  %s283_s10 = scalar_lea.sflag [#allocation9], %s1891_s6  ;;  %s296_s20 = int_to_ptr.vmem [resolvable:$true] %s295_s20 }
  0x86   : > { %s1566_s23 = scalar_lea.hbm %s2042_s27, 128  ;;  %s1571_s16 = scalar_lea.hbm %s2612_s3, 768 }
  0x87   : > { %p1567_p6 = scmp.ne.s32.totalorder %s2042_s27, %s1566_s23  ;;  %p1572_p10 = scmp.lt.u32.totalorder %s2042_s27, %s2612_s3 }
  0x88   : > { %p1573_p1 = scmp.lt.u32.totalorder %s1571_s16, %s1566_s23  ;;  %p1575_p13 = scmp.lt.u32.totalorder %s1566_s23, %s2042_s27 }
  0x89   : > { %p1569_p11 = pnand %p1567_p6, %p1921_p5 }
  0x8a   : > { %p1574_p9 = por %p1573_p1, %p1572_p10 }
  0x8b   : > { %p1570_p4 = pneg %p1569_p11 }
  0x8c   : > { %p1576_p0 = por %p1575_p13, %p1574_p9 }
  0x8e   : > { %p1577_p7 = pnand %p1576_p0, %p1570_p4 }
  0x90   : > { %1580 = shalt.err (!%p1577_p7)
}
  0x91   : > { %s1581_s6 = scalar_lea.vmem %s296_s20, 128  ;;  %s1747_s13 = smov [#allocation8]  }
  0x92   : > { %p1582_p3 = scmp.ne.s32.totalorder %s296_s20, %s1581_s6  ;;  %s1586_s14 = sshll.u32 %s1747_s13, 4  ;;  %s1587_s14 = int_to_ptr.vmem [resolvable:$false] %s1586_s14 }
  0x93   : > { %s1588_s12 = scalar_lea.vmem %s1587_s14, 256  ;;  %p1589_p6 = scmp.lt.s32.totalorder %s296_s20, %s1587_s14 }
  0x94   : > { %p1584_p8 = pnand %p1582_p3, %p1921_p5  ;;  %p1590_p11 = scmp.lt.s32.totalorder %s1588_s12, %s1581_s6 }
  0x96   : > { %p1585_p2 = pneg %p1584_p8  ;;  %p1591_p12 = por %p1590_p11, %p1589_p6 }
  0x98   : > { %p1592_p1 = pnand %p1591_p12, %p1585_p2 }
  0x9a   : > { %1595 = shalt.err (!%p1592_p1)
}
  0x9b   : > { %p2667_p10 = scmp.ne.s32.totalorder %s2653_s30, 0  ;;  %p2668_p4 = scmp.ne.s32.totalorder %s2656_s15, 0 }
  0x9c   : > { %s316_s7 = sand.u32 (!%p2668_p4), 1, %s1710_s22   ;;  %p2669_p5 = scmp.ne.s32.totalorder (!%p2668_p4), %s2661_s8, 0 }
  0x9d   : > { %1361 = dma.hbm_to_vmem [thread:$0]  (!%p2667_p10), %s2042_s27, 128, %s296_s20, %s283_s10  }
  0x9e   : > { %314 = sbr.rel (%p2668_p4) target bundleno = 555 (0x22b), region = 40  ;;  %s317_s21 = scalar_lea.sflag (!%p2668_p4), [#allocation3], %s316_s7 }
  0x9f   : > { %s2067_s26 = smul.u32 (!%p2668_p4), 12, %s316_s7 }
  0xa1   : > { %s320_s1 = scalar_lea.vmem (!%p2668_p4), [#allocation2], %s2067_s26 }
  0xa5   : > { %1677 = dma.done.wait (%p2669_p5), %s317_s21, 192  }
  0xa6   : > { %1679 = vsyncadd (%p2669_p5), %s317_s21, 4294967104  ;;  %s325_s30 = sand.u32 1, %s1839_s29   ;;  %s2076_s27 = sand.u32 1, %s1698_s19  }
  0xa7   : > { %s1245_s15 = sshll.u32 %s2076_s27, 2  ;;  %s326_s5 = scalar_lea.sflag [#allocation6], %s325_s30 }
  0xa8   : > { %s329_s20 = scalar_lea.vmem [#allocation5], %s1245_s15  ;;  %p2670_p12 = scmp.ne.s32.totalorder %s2647_s11, 0 }
  0xaa   : > { %1681 = dma.done.wait (%p2670_p12), %s326_s5, 192  }
  0xab   : > { %1683 = vsyncadd (%p2670_p12), %s326_s5, 4294967104  ;;  %s1246_s8 = sshll.u32 %s2076_s27, 3  ;;  %s344_s23 = scalar_lea.sflag [#allocation9], %s2076_s27 }
  0xac   : > { %s338_s10 = scalar_lea.vmem [#allocation7], %s1246_s8  ;;  %s347_s9 = scalar_lea.vmem [#allocation8], %s1246_s8 }
  0xad   : > { %1685 = dma.done.wait (%p2670_p12), %s344_s23, 128  }
  0xae   : > { %1687 = vsyncadd (%p2670_p12), %s344_s23, 4294967168  ;;  %p396_p9 = scmp.lt.s32.totalorder %s1722_s25, 1  ;;  %p398_p13 = scmp.lt.s32.totalorder %s1718_s24, 2  ;;  %v2096_v0 = vld [vmem:[%s329_s20] sm:$0xf]  ;;  %v2098_v1 = vld [vmem:[%s338_s10] sm:$0xff] }
  0xaf   : > { %v2100_v2 = vld [vmem:[%s347_s9] sm:$0xff]  ;;  %s2104_s11 = scalar_lea.vmem [#allocation10], %s1245_s15  ;;  %v2106_v4 = vmov 0.0   ;;  %s2108_s14 = smov 0  }
  0xb0   : > { %s397_s29 = scalar_select %p396_p9, %s1722_s25, 1 }
  0xb1   : > { %s399_s18 = scalar_select %p398_p13, %s1718_s24, 2 }
  0xb2   : > { %s1337_s16 = smul.u32 3, %s397_s29 }
  0xb4   : > { %s401_s17 = sadd.s32 %s1337_s16, %s399_s18 }
  0xb5   : > { %s402_s13 = scalar_lea.vmem %s2613_s4, %s401_s17 }
  0xb6   : > { %v2102_v3 = vld [vmem:[%s402_s13] sm:$0x1] }
  0xb7 LB: >> { %v415_v5 = vlaneseq  ;;  %v1748_v6 = vmov 0.0|0.0   ;;  %vm1749_vm0 = vmmov 0   ;;  %v1750_v7 = vmov 0.0   ;;  %s1249_s12 = sshll.u32 %s1742_s14, 7  ;;  %s412_s14 = sadd.s32 1, %s1742_s14   ;;  %s1742_s14 = sphi %s2108_s14, %s412_s14   ;;  %v1738_v4 = vphi %v2106_v4, %v2671_v4  }
  0xb8   : >> { %1307 = vmatprep.subr.bf16.mxu0 %v1748_v6  ;;  %1304 = vmatprep.mubr.msk.f32.mxu0 %vm1749_vm0, %v1750_v7  ;;  %v2122_v9 = vstv %s1249_s12  ;;  %s897_s7 = sshra.s32 %s1249_s12, 7  ;;  %p409_p0 = scmp.ge.s32.totalorder %s412_s14, 3  }
  0xb9   : >> { %v2118_v8 = vshrl.u32 %v415_v5, 7  ;;  %s1250_s21 = sshll.u32 %s897_s7, 2  ;;  %s1338_s26 = smul.u32 (%p409_p0), 3, %s1722_s25 }
  0xba   : >> { %s900_s30 = scalar_lea.vmem %s320_s1, %s1250_s21 [#allocation2]  ;;  %s2672_s15 = sld [smem:[#allocation23_spill]] (%p409_p0) }
  0xbb   : >> { %v417_v10 = vadd.s32 8, %v2118_v8  ;;  %v2127_v11 = vadd.s32 %v2122_v9, %v2118_v8  ;;  %v2130_v12 = vsub.s32 0, %v2118_v8  ;;  %v507_v13 = vsub.s32 1, %v2118_v8  ;;  %s1049_s1 = sadd.s32 (%p409_p0), %s1718_s24, %s1338_s26  ;;  %s1053_s20 = sshll.u32 (%p409_p0), %s2104_s11, 4  ;;  %s2547_s20 = int_to_ptr.vmem [resolvable:$true] %s1053_s20 }
  0xbc   : >> { %v563_v14 = vsub.s32 2, %v2118_v8  ;;  %v619_v15 = vsub.s32 3, %v2118_v8  ;;  %v675_v16 = vsub.s32 4, %v2118_v8  ;;  %v731_v17 = vsub.s32 5, %v2118_v8  ;;  %s1252_s5 = sshll.u32 (%p409_p0), %s1049_s1, 6  ;;  %s2673_s10 = sld [smem:[#allocation28_spill]] (%p409_p0) }
  0xbd   : >> { %v2138_v18 = vadd.s32 %v2122_v9, %v417_v10  ;;  %v2142_v19 = vrot.slane %v2098_v1, %v2130_v12  ;;  %v2146_v20 = vrot.slane %v2100_v2, %v2130_v12  ;;  %v2149_v21 = vrot.slane %v2098_v1, %v507_v13  ;;  %s1038_s24 = scalar_lea.sflag (%p409_p0), [#allocation4], %s2076_s27  ;;  %s1596_s9 = scalar_lea.vmem (%p409_p0), %s2547_s20, 64 }
  0xbe   : >> { %v2152_v22 = vrot.slane %v2100_v2, %v507_v13  ;;  %v2155_v23 = vrot.slane %v2098_v1, %v563_v14  ;;  %v2158_v24 = vrot.slane %v2100_v2, %v563_v14  ;;  %v2161_v25 = vrot.slane %v2098_v1, %v619_v15  ;;  %p1597_p7 = scmp.ne.s32.totalorder (%p409_p0), %s2547_s20, %s1596_s9  ;;  %s1752_s29 = smov (%p409_p0), [#allocation10]  }
  0xbf   : >> { %vm453_vm1 = vcmp.eq.s32.totalorder %v2127_v11, %v2142_v19  ;;  %vm454_vm2 = vcmp.eq.s32.totalorder %v2138_v18, %v2142_v19  ;;  %vm509_vm3 = vcmp.eq.s32.totalorder %v2127_v11, %v2149_v21  ;;  %vm510_vm4 = vcmp.eq.s32.totalorder %v2138_v18, %v2149_v21  ;;  %s1600_s18 = sshll.u32 (%p409_p0), %s1752_s29, 4  ;;  %s1601_s18 = int_to_ptr.vmem [resolvable:$false] %s1600_s18 }
  0xc0   : >> { %v473_v26 = vsel %vm453_vm1, %v2146_v20, 0.0  ;;  %v474_v27 = vsel %vm454_vm2, %v2146_v20, 0.0  ;;  %v529_v28 = vsel %vm509_vm3, %v2152_v22, 0.0  ;;  %v530_v29 = vsel %vm510_vm4, %v2152_v22, 0.0  ;;  %p2674_p3 = scmp.ne.s32.totalorder (%p409_p0), %s2672_s15, 0  ;;  %s1602_s16 = scalar_lea.vmem (%p409_p0), %s1601_s18, 128 }
  0xc1   : >> { %v545_v30 = vadd.f32 %v529_v28, %v473_v26  ;;  %v546_v31 = vadd.f32 %v530_v29, %v474_v27  ;;  %vm565_vm5 = vcmp.eq.s32.totalorder %v2127_v11, %v2155_v23  ;;  %vm566_vm6 = vcmp.eq.s32.totalorder %v2138_v18, %v2155_v23  ;;  %p1603_p6 = scmp.lt.s32.totalorder (%p409_p0), %s2547_s20, %s1601_s18  ;;  %p1604_p11 = scmp.lt.s32.totalorder (%p409_p0), %s1602_s16, %s1596_s9 }
  0xc2   : >> { %v585_v32 = vsel %vm565_vm5, %v2158_v24, 0.0  ;;  %v586_v33 = vsel %vm566_vm6, %v2158_v24, 0.0  ;;  %vm621_vm7 = vcmp.eq.s32.totalorder %v2127_v11, %v2161_v25  ;;  %vm622_vm8 = vcmp.eq.s32.totalorder %v2138_v18, %v2161_v25  ;;  %s2545_s23 = scalar_lea.hbm (%p409_p0), %s2673_s10, %s1252_s5  ;;  %p1598_p8 = pnand (%p409_p0), %p1597_p7, %p2674_p3 }
  0xc3   : >> { %v601_v34 = vadd.f32 %v585_v32, %v545_v30  ;;  %v602_v35 = vadd.f32 %v586_v33, %v546_v31  ;;  %v2186_v36 = vrot.slane %v2100_v2, %v619_v15  ;;  %v2189_v37 = vrot.slane %v2098_v1, %v675_v16  ;;  %p1605_p1 = por (%p409_p0), %p1604_p11, %p1603_p6 }
  0xc4   : >> { %v2192_v38 = vrot.slane %v2100_v2, %v675_v16  ;;  %v2195_v39 = vrot.slane %v2098_v1, %v731_v17  ;;  %v2198_v40 = vrot.slane %v2100_v2, %v731_v17  ;;  %v787_v41 = vsub.s32 6, %v2118_v8  ;;  %p1599_p2 = pneg (%p409_p0), %p1598_p8 }
  0xc5   : >> { %v641_v42 = vsel %vm621_vm7, %v2186_v36, 0.0  ;;  %v642_v43 = vsel %vm622_vm8, %v2186_v36, 0.0  ;;  %vm677_vm9 = vcmp.eq.s32.totalorder %v2127_v11, %v2189_v37  ;;  %vm678_vm10 = vcmp.eq.s32.totalorder %v2138_v18, %v2189_v37 }
  0xc6   : >> { %v657_v44 = vadd.f32 %v641_v42, %v601_v34  ;;  %v658_v45 = vadd.f32 %v642_v43, %v602_v35  ;;  %v697_v46 = vsel %vm677_vm9, %v2192_v38, 0.0  ;;  %v698_v47 = vsel %vm678_vm10, %v2192_v38, 0.0  ;;  %p1606_p10 = pnand (%p409_p0), %p1605_p1, %p1599_p2 }
  0xc7   : >> { %vm733_vm11 = vcmp.eq.s32.totalorder %v2127_v11, %v2195_v39  ;;  %vm734_vm12 = vcmp.eq.s32.totalorder %v2138_v18, %v2195_v39  ;;  %v2214_v48 = vrot.slane %v2098_v1, %v787_v41  ;;  %v2217_v49 = vrot.slane %v2100_v2, %v787_v41 }
  0xc8   : >> { %v713_v50 = vadd.f32 %v697_v46, %v657_v44  ;;  %v714_v51 = vadd.f32 %v698_v47, %v658_v45  ;;  %v753_v52 = vsel %vm733_vm11, %v2198_v40, 0.0  ;;  %v754_v53 = vsel %vm734_vm12, %v2198_v40, 0.0 }
  0xc9   : >> { %vm789_vm13 = vcmp.eq.s32.totalorder %v2127_v11, %v2214_v48  ;;  %vm790_vm14 = vcmp.eq.s32.totalorder %v2138_v18, %v2214_v48  ;;  %v843_v54 = vsub.s32 7, %v2118_v8  ;;  %v418_v55 = vadd.s32 16, %v2118_v8 }
  0xca   : >> { %v769_v56 = vadd.f32 %v753_v52, %v713_v50  ;;  %v770_v57 = vadd.f32 %v754_v53, %v714_v51  ;;  %v809_v58 = vsel %vm789_vm13, %v2217_v49, 0.0  ;;  %v810_v59 = vsel %vm790_vm14, %v2217_v49, 0.0 }
  0xcb   : >> { %v2230_v60 = vrot.slane %v2098_v1, %v843_v54  ;;  %v2233_v61 = vrot.slane %v2100_v2, %v843_v54  ;;  %v419_v62 = vadd.s32 24, %v2118_v8  ;;  %v435_v63 = vadd.s32 %v2122_v9, %v418_v55 }
  0xcc   : >> { %v825_v5 = vadd.f32 %v809_v58, %v769_v56  ;;  %v826_v7 = vadd.f32 %v810_v59, %v770_v57  ;;  %v420_v10 = vadd.s32 32, %v2118_v8  ;;  %v421_v13 = vadd.s32 40, %v2118_v8 }
  0xcd   : >> { %vm845_vm15 = vcmp.eq.s32.totalorder %v2127_v11, %v2230_v60  ;;  %vm846_vm0 = vcmp.eq.s32.totalorder %v2138_v18, %v2230_v60  ;;  %v436_v14 = vadd.s32 %v2122_v9, %v419_v62  ;;  %vm455_vm1 = vcmp.eq.s32.totalorder %v435_v63, %v2142_v19 }
  0xce   : >> { %v865_v15 = vsel %vm845_vm15, %v2233_v61, 0.0  ;;  %v866_v16 = vsel %vm846_vm0, %v2233_v61, 0.0  ;;  %v475_v17 = vsel %vm455_vm1, %v2146_v20, 0.0  ;;  %vm511_vm2 = vcmp.eq.s32.totalorder %v435_v63, %v2149_v21 }
  0xcf   : >> { %v881_v26 = vadd.f32 %v865_v15, %v825_v5  ;;  %v882_v27 = vadd.f32 %v866_v16, %v826_v7  ;;  %vm456_vm3 = vcmp.eq.s32.totalorder %v436_v14, %v2142_v19  ;;  %vm512_vm4 = vcmp.eq.s32.totalorder %v436_v14, %v2149_v21 }
  0xd0   : >> { %v476_v11 = vsel %vm456_vm3, %v2146_v20, 0.0  ;;  %v531_v18 = vsel %vm511_vm2, %v2152_v22, 0.0  ;;  %v532_v28 = vsel %vm512_vm4, %v2152_v22, 0.0  ;;  %vm567_vm5 = vcmp.eq.s32.totalorder %v435_v63, %v2155_v23 }
  0xd1   : >> { %v1308_v29 = vpack.c.bf16 %v882_v27, %v881_v26  ;;  %v547_v30 = vadd.f32 %v531_v18, %v475_v17  ;;  %v548_v31 = vadd.f32 %v532_v28, %v476_v11  ;;  %vm568_vm6 = vcmp.eq.s32.totalorder %v436_v14, %v2155_v23 }
  0xd2   : >> { %v587_v32 = vsel %vm567_vm5, %v2158_v24, 0.0  ;;  %v588_v33 = vsel %vm568_vm6, %v2158_v24, 0.0  ;;  %vm623_vm7 = vcmp.eq.s32.totalorder %v435_v63, %v2161_v25  ;;  %vm624_vm8 = vcmp.eq.s32.totalorder %v436_v14, %v2161_v25 }
  0xd3   : >> { %1309 = vmatpush3.bf16.msra.mxu0 %v1308_v29  ;;  %v603_v34 = vadd.f32 %v587_v32, %v547_v30  ;;  %v604_v35 = vadd.f32 %v588_v33, %v548_v31  ;;  %v643_v41 = vsel %vm623_vm7, %v2186_v36, 0.0  ;;  %v644_v42 = vsel %vm624_vm8, %v2186_v36, 0.0 }
  0xd4   : >> { %1310 = vmatprep.subr.bf16.mxu0 %v1748_v6  ;;  %vm679_vm9 = vcmp.eq.s32.totalorder %v435_v63, %v2189_v37  ;;  %vm680_vm10 = vcmp.eq.s32.totalorder %v436_v14, %v2189_v37  ;;  %vm735_vm11 = vcmp.eq.s32.totalorder %v435_v63, %v2195_v39  ;;  %vm736_vm12 = vcmp.eq.s32.totalorder %v436_v14, %v2195_v39 }
  0xd5   : >> { %v659_v43 = vadd.f32 %v643_v41, %v603_v34  ;;  %v660_v44 = vadd.f32 %v644_v42, %v604_v35  ;;  %v699_v45 = vsel %vm679_vm9, %v2192_v38, 0.0  ;;  %v700_v46 = vsel %vm680_vm10, %v2192_v38, 0.0 }
  0xd6   : >> { %v755_v47 = vsel %vm735_vm11, %v2198_v40, 0.0  ;;  %v756_v50 = vsel %vm736_vm12, %v2198_v40, 0.0  ;;  %vm791_vm13 = vcmp.eq.s32.totalorder %v435_v63, %v2214_v48  ;;  %vm792_vm14 = vcmp.eq.s32.totalorder %v436_v14, %v2214_v48 }
  0xd7   : >> { %v715_v51 = vadd.f32 %v699_v45, %v659_v43  ;;  %v716_v52 = vadd.f32 %v700_v46, %v660_v44  ;;  %v811_v53 = vsel %vm791_vm13, %v2217_v49, 0.0  ;;  %v812_v54 = vsel %vm792_vm14, %v2217_v49, 0.0 }
  0xd8   : >> { %vm847_vm15 = vcmp.eq.s32.totalorder %v435_v63, %v2230_v60  ;;  %vm848_vm0 = vcmp.eq.s32.totalorder %v436_v14, %v2230_v60  ;;  %v437_v55 = vadd.s32 %v2122_v9, %v420_v10  ;;  %v438_v56 = vadd.s32 %v2122_v9, %v421_v13 }
  0xd9   : >> { %v771_v57 = vadd.f32 %v755_v47, %v715_v51  ;;  %v772_v58 = vadd.f32 %v756_v50, %v716_v52  ;;  %v867_v59 = vsel %vm847_vm15, %v2233_v61, 0.0  ;;  %v868_v62 = vsel %vm848_vm0, %v2233_v61, 0.0 }
  0xda   : >> { %vm457_vm1 = vcmp.eq.s32.totalorder %v437_v55, %v2142_v19  ;;  %vm458_vm2 = vcmp.eq.s32.totalorder %v438_v56, %v2142_v19  ;;  %vm513_vm3 = vcmp.eq.s32.totalorder %v437_v55, %v2149_v21  ;;  %vm514_vm4 = vcmp.eq.s32.totalorder %v438_v56, %v2149_v21 }
  0xdb   : >> { %v827_v63 = vadd.f32 %v811_v53, %v771_v57  ;;  %v828_v5 = vadd.f32 %v812_v54, %v772_v58  ;;  %v477_v7 = vsel %vm457_vm1, %v2146_v20, 0.0  ;;  %v478_v10 = vsel %vm458_vm2, %v2146_v20, 0.0 }
  0xdc   : >> { %v533_v13 = vsel %vm513_vm3, %v2152_v22, 0.0  ;;  %v534_v14 = vsel %vm514_vm4, %v2152_v22, 0.0  ;;  %vm569_vm5 = vcmp.eq.s32.totalorder %v437_v55, %v2155_v23  ;;  %vm570_vm6 = vcmp.eq.s32.totalorder %v438_v56, %v2155_v23 }
  0xdd   : >> { %v883_v15 = vadd.f32 %v867_v59, %v827_v63  ;;  %v884_v16 = vadd.f32 %v868_v62, %v828_v5  ;;  %v549_v17 = vadd.f32 %v533_v13, %v477_v7  ;;  %v550_v26 = vadd.f32 %v534_v14, %v478_v10 }
  0xde   : >> { %v589_v27 = vsel %vm569_vm5, %v2158_v24, 0.0  ;;  %v590_v11 = vsel %vm570_vm6, %v2158_v24, 0.0  ;;  %vm625_vm7 = vcmp.eq.s32.totalorder %v437_v55, %v2161_v25  ;;  %vm626_vm8 = vcmp.eq.s32.totalorder %v438_v56, %v2161_v25 }
  0xdf   : >> { %v1311_v18 = vpack.c.bf16 %v884_v16, %v883_v15  ;;  %v605_v28 = vadd.f32 %v589_v27, %v549_v17  ;;  %v606_v29 = vadd.f32 %v590_v11, %v550_v26  ;;  %v645_v30 = vsel %vm625_vm7, %v2186_v36, 0.0 }
  0xe0   : >> { %v646_v31 = vsel %vm626_vm8, %v2186_v36, 0.0  ;;  %vm681_vm9 = vcmp.eq.s32.totalorder %v437_v55, %v2189_v37  ;;  %vm682_vm10 = vcmp.eq.s32.totalorder %v438_v56, %v2189_v37  ;;  %vm737_vm11 = vcmp.eq.s32.totalorder %v437_v55, %v2195_v39 }
  0xe1   : >> { %1312 = vmatpush3.bf16.msra.mxu0 %v1311_v18  ;;  %v661_v32 = vadd.f32 %v645_v30, %v605_v28  ;;  %v662_v33 = vadd.f32 %v646_v31, %v606_v29  ;;  %v701_v34 = vsel %vm681_vm9, %v2192_v38, 0.0  ;;  %v702_v35 = vsel %vm682_vm10, %v2192_v38, 0.0 }
  0xe2   : >> { %1313 = vmatprep.subr.bf16.mxu0 %v1748_v6  ;;  %vm738_vm12 = vcmp.eq.s32.totalorder %v438_v56, %v2195_v39  ;;  %v757_v41 = vsel %vm737_vm11, %v2198_v40, 0.0  ;;  %vm793_vm13 = vcmp.eq.s32.totalorder %v437_v55, %v2214_v48  ;;  %vm794_vm14 = vcmp.eq.s32.totalorder %v438_v56, %v2214_v48 }
  0xe3   : >> { %v717_v42 = vadd.f32 %v701_v34, %v661_v32  ;;  %v718_v43 = vadd.f32 %v702_v35, %v662_v33  ;;  %v758_v44 = vsel %vm738_vm12, %v2198_v40, 0.0  ;;  %v813_v45 = vsel %vm793_vm13, %v2217_v49, 0.0 }
  0xe4   : >> { %v814_v46 = vsel %vm794_vm14, %v2217_v49, 0.0  ;;  %vm849_vm15 = vcmp.eq.s32.totalorder %v437_v55, %v2230_v60  ;;  %vm850_vm0 = vcmp.eq.s32.totalorder %v438_v56, %v2230_v60  ;;  %v422_v47 = vadd.s32 48, %v2118_v8 }
  0xe5   : >> { %v773_v50 = vadd.f32 %v757_v41, %v717_v42  ;;  %v774_v51 = vadd.f32 %v758_v44, %v718_v43  ;;  %v869_v52 = vsel %vm849_vm15, %v2233_v61, 0.0  ;;  %v870_v53 = vsel %vm850_vm0, %v2233_v61, 0.0 }
  0xe6   : >> { %v423_v54 = vadd.s32 56, %v2118_v8  ;;  %v439_v57 = vadd.s32 %v2122_v9, %v422_v47  ;;  %v424_v58 = vadd.s32 64, %v2118_v8  ;;  %v425_v59 = vadd.s32 72, %v2118_v8 }
  0xe7   : >> { %v829_v62 = vadd.f32 %v813_v45, %v773_v50  ;;  %v830_v55 = vadd.f32 %v814_v46, %v774_v51  ;;  %v426_v56 = vadd.s32 80, %v2118_v8  ;;  %v427_v63 = vadd.s32 88, %v2118_v8 }
  0xe8   : >> { %v440_v5 = vadd.s32 %v2122_v9, %v423_v54  ;;  %vm459_vm1 = vcmp.eq.s32.totalorder %v439_v57, %v2142_v19  ;;  %vm515_vm2 = vcmp.eq.s32.totalorder %v439_v57, %v2149_v21  ;;  %vm571_vm3 = vcmp.eq.s32.totalorder %v439_v57, %v2155_v23 }
  0xe9   : >> { %v885_v7 = vadd.f32 %v869_v52, %v829_v62  ;;  %v886_v10 = vadd.f32 %v870_v53, %v830_v55  ;;  %v479_v13 = vsel %vm459_vm1, %v2146_v20, 0.0  ;;  %v535_v14 = vsel %vm515_vm2, %v2152_v22, 0.0 }
  0xea   : >> { %vm460_vm4 = vcmp.eq.s32.totalorder %v440_v5, %v2142_v19  ;;  %vm516_vm5 = vcmp.eq.s32.totalorder %v440_v5, %v2149_v21  ;;  %v551_v15 = vadd.f32 %v535_v14, %v479_v13  ;;  %vm572_vm6 = vcmp.eq.s32.totalorder %v440_v5, %v2155_v23 }
  0xeb   : >> { %v1314_v16 = vpack.c.bf16 %v886_v10, %v885_v7  ;;  %v480_v17 = vsel %vm460_vm4, %v2146_v20, 0.0  ;;  %v536_v26 = vsel %vm516_vm5, %v2152_v22, 0.0  ;;  %v591_v27 = vsel %vm571_vm3, %v2158_v24, 0.0 }
  0xec   : >> { %v552_v11 = vadd.f32 %v536_v26, %v480_v17  ;;  %v592_v18 = vsel %vm572_vm6, %v2158_v24, 0.0  ;;  %v607_v28 = vadd.f32 %v591_v27, %v551_v15  ;;  %vm627_vm7 = vcmp.eq.s32.totalorder %v439_v57, %v2161_v25 }
  0xed   : >> { %1315 = vmatpush3.bf16.msra.mxu0 %v1314_v16  ;;  %vm628_vm8 = vcmp.eq.s32.totalorder %v440_v5, %v2161_v25  ;;  %v647_v29 = vsel %vm627_vm7, %v2186_v36, 0.0  ;;  %vm683_vm9 = vcmp.eq.s32.totalorder %v439_v57, %v2189_v37  ;;  %vm684_vm10 = vcmp.eq.s32.totalorder %v440_v5, %v2189_v37 }
  0xee   : >> { %1316 = vmatprep.subr.bf16.mxu0 %v1748_v6  ;;  %v608_v30 = vadd.f32 %v592_v18, %v552_v11  ;;  %v648_v31 = vsel %vm628_vm8, %v2186_v36, 0.0  ;;  %v663_v32 = vadd.f32 %v647_v29, %v607_v28  ;;  %v703_v33 = vsel %vm683_vm9, %v2192_v38, 0.0 }
  0xef   : >> { %v704_v34 = vsel %vm684_vm10, %v2192_v38, 0.0  ;;  %vm739_vm11 = vcmp.eq.s32.totalorder %v439_v57, %v2195_v39  ;;  %vm740_vm12 = vcmp.eq.s32.totalorder %v440_v5, %v2195_v39  ;;  %vm795_vm13 = vcmp.eq.s32.totalorder %v439_v57, %v2214_v48 }
  0xf0   : >> { %v664_v35 = vadd.f32 %v648_v31, %v608_v30  ;;  %v719_v41 = vadd.f32 %v703_v33, %v663_v32  ;;  %v759_v42 = vsel %vm739_vm11, %v2198_v40, 0.0  ;;  %v760_v43 = vsel %vm740_vm12, %v2198_v40, 0.0 }
  0xf1   : >> { %vm796_vm14 = vcmp.eq.s32.totalorder %v440_v5, %v2214_v48  ;;  %v815_v44 = vsel %vm795_vm13, %v2217_v49, 0.0  ;;  %vm851_vm15 = vcmp.eq.s32.totalorder %v439_v57, %v2230_v60  ;;  %vm852_vm0 = vcmp.eq.s32.totalorder %v440_v5, %v2230_v60 }
  0xf2   : >> { %v720_v45 = vadd.f32 %v704_v34, %v664_v35  ;;  %v775_v46 = vadd.f32 %v759_v42, %v719_v41  ;;  %v816_v47 = vsel %vm796_vm14, %v2217_v49, 0.0  ;;  %v871_v50 = vsel %vm851_vm15, %v2233_v61, 0.0 }
  0xf3   : >> { %v872_v51 = vsel %vm852_vm0, %v2233_v61, 0.0  ;;  %v441_v52 = vadd.s32 %v2122_v9, %v424_v58  ;;  %v442_v53 = vadd.s32 %v2122_v9, %v425_v59  ;;  %v2358_v54 = vadd.s32 %v2122_v9, %v426_v56 }
  0xf4   : >> { %v776_v62 = vadd.f32 %v760_v43, %v720_v45  ;;  %v831_v55 = vadd.f32 %v815_v44, %v775_v46  ;;  %v2361_v57 = vadd.s32 %v2122_v9, %v427_v63  ;;  %v2364_v5 = vadd.s32 96, %v2118_v8 }
  0xf5   : >> { %vm461_vm1 = vcmp.eq.s32.totalorder %v441_v52, %v2142_v19  ;;  %vm462_vm2 = vcmp.eq.s32.totalorder %v442_v53, %v2142_v19  ;;  %vm517_vm3 = vcmp.eq.s32.totalorder %v441_v52, %v2149_v21  ;;  %vm518_vm4 = vcmp.eq.s32.totalorder %v442_v53, %v2149_v21 }
  0xf6   : >> { %v832_v58 = vadd.f32 %v816_v47, %v776_v62  ;;  %v887_v59 = vadd.f32 %v871_v50, %v831_v55  ;;  %v481_v56 = vsel %vm461_vm1, %v2146_v20, 0.0  ;;  %v482_v7 = vsel %vm462_vm2, %v2146_v20, 0.0 }
  0xf7   : >> { %v537_v63 = vsel %vm517_vm3, %v2152_v22, 0.0  ;;  %v538_v10 = vsel %vm518_vm4, %v2152_v22, 0.0  ;;  %vm573_vm5 = vcmp.eq.s32.totalorder %v441_v52, %v2155_v23  ;;  %vm574_vm6 = vcmp.eq.s32.totalorder %v442_v53, %v2155_v23 }
  0xf8   : >> { %v888_v13 = vadd.f32 %v872_v51, %v832_v58  ;;  %v553_v14 = vadd.f32 %v537_v63, %v481_v56  ;;  %v554_v15 = vadd.f32 %v538_v10, %v482_v7  ;;  %v593_v16 = vsel %vm573_vm5, %v2158_v24, 0.0 }
  0xf9   : >> { %v594_v17 = vsel %vm574_vm6, %v2158_v24, 0.0  ;;  %vm629_vm7 = vcmp.eq.s32.totalorder %v441_v52, %v2161_v25  ;;  %vm630_vm8 = vcmp.eq.s32.totalorder %v442_v53, %v2161_v25  ;;  %vm685_vm9 = vcmp.eq.s32.totalorder %v441_v52, %v2189_v37 }
  0xfa   : >> { %v1317_v26 = vpack.c.bf16 %v888_v13, %v887_v59  ;;  %v609_v27 = vadd.f32 %v593_v16, %v553_v14  ;;  %v610_v11 = vadd.f32 %v594_v17, %v554_v15  ;;  %v649_v18 = vsel %vm629_vm7, %v2186_v36, 0.0 }
  0xfb   : >> { %v650_v28 = vsel %vm630_vm8, %v2186_v36, 0.0  ;;  %vm686_vm10 = vcmp.eq.s32.totalorder %v442_v53, %v2189_v37  ;;  %v705_v29 = vsel %vm685_vm9, %v2192_v38, 0.0  ;;  %vm741_vm11 = vcmp.eq.s32.totalorder %v441_v52, %v2195_v39 }
  0xfc   : >> { %1318 = vmatpush3.bf16.msra.mxu0 %v1317_v26  ;;  %v665_v30 = vadd.f32 %v649_v18, %v609_v27  ;;  %v666_v31 = vadd.f32 %v650_v28, %v610_v11  ;;  %v706_v32 = vsel %vm686_vm10, %v2192_v38, 0.0  ;;  %vm742_vm12 = vcmp.eq.s32.totalorder %v442_v53, %v2195_v39 }
  0xfd   : >> { %1319 = vmatprep.subr.bf16.mxu0 %v1748_v6  ;;  %v761_v33 = vsel %vm741_vm11, %v2198_v40, 0.0  ;;  %v762_v34 = vsel %vm742_vm12, %v2198_v40, 0.0  ;;  %vm797_vm13 = vcmp.eq.s32.totalorder %v441_v52, %v2214_v48  ;;  %vm798_vm14 = vcmp.eq.s32.totalorder %v442_v53, %v2214_v48 }
  0xfe   : >> { %v721_v35 = vadd.f32 %v705_v29, %v665_v30  ;;  %v722_v41 = vadd.f32 %v706_v32, %v666_v31  ;;  %v817_v42 = vsel %vm797_vm13, %v2217_v49, 0.0  ;;  %v818_v43 = vsel %vm798_vm14, %v2217_v49, 0.0 }
  0xff   : >> { %vm853_vm15 = vcmp.eq.s32.totalorder %v441_v52, %v2230_v60  ;;  %vm854_vm0 = vcmp.eq.s32.totalorder %v442_v53, %v2230_v60  ;;  %vm463_vm1 = vcmp.eq.s32.totalorder %v2358_v54, %v2142_v19  ;;  %vm464_vm2 = vcmp.eq.s32.totalorder %v2361_v57, %v2142_v19 }
 0x100   : >> { %v777_v44 = vadd.f32 %v761_v33, %v721_v35  ;;  %v778_v45 = vadd.f32 %v762_v34, %v722_v41  ;;  %v873_v46 = vsel %vm853_vm15, %v2233_v61, 0.0  ;;  %v874_v47 = vsel %vm854_vm0, %v2233_v61, 0.0 }
 0x101   : >> { %v483_v50 = vsel %vm463_vm1, %v2146_v20, 0.0  ;;  %v484_v51 = vsel %vm464_vm2, %v2146_v20, 0.0  ;;  %vm519_vm3 = vcmp.eq.s32.totalorder %v2358_v54, %v2149_v21  ;;  %vm520_vm4 = vcmp.eq.s32.totalorder %v2361_v57, %v2149_v21 }
 0x102   : >> { %v833_v52 = vadd.f32 %v817_v42, %v777_v44  ;;  %v834_v53 = vadd.f32 %v818_v43, %v778_v45  ;;  %v539_v62 = vsel %vm519_vm3, %v2152_v22, 0.0  ;;  %v540_v55 = vsel %vm520_vm4, %v2152_v22, 0.0 }
 0x103   : >> { %v555_v58 = vadd.f32 %v539_v62, %v483_v50  ;;  %v556_v59 = vadd.f32 %v540_v55, %v484_v51  ;;  %vm575_vm5 = vcmp.eq.s32.totalorder %v2358_v54, %v2155_v23  ;;  %vm576_vm6 = vcmp.eq.s32.totalorder %v2361_v57, %v2155_v23 }
 0x104   : >> { %v889_v56 = vadd.f32 %v873_v46, %v833_v52  ;;  %v890_v7 = vadd.f32 %v874_v47, %v834_v53  ;;  %v595_v63 = vsel %vm575_vm5, %v2158_v24, 0.0  ;;  %v596_v10 = vsel %vm576_vm6, %v2158_v24, 0.0 }
 0x105   : >> { %v611_v13 = vadd.f32 %v595_v63, %v555_v58  ;;  %v612_v14 = vadd.f32 %v596_v10, %v556_v59  ;;  %vm631_vm7 = vcmp.eq.s32.totalorder %v2358_v54, %v2161_v25  ;;  %vm632_vm8 = vcmp.eq.s32.totalorder %v2361_v57, %v2161_v25 }
 0x106   : >> { %v1320_v15 = vpack.c.bf16 %v890_v7, %v889_v56  ;;  %v651_v16 = vsel %vm631_vm7, %v2186_v36, 0.0  ;;  %v652_v17 = vsel %vm632_vm8, %v2186_v36, 0.0  ;;  %vm687_vm9 = vcmp.eq.s32.totalorder %v2358_v54, %v2189_v37 }
 0x107   : >> { %v667_v26 = vadd.f32 %v651_v16, %v611_v13  ;;  %v668_v27 = vadd.f32 %v652_v17, %v612_v14  ;;  %vm688_vm10 = vcmp.eq.s32.totalorder %v2361_v57, %v2189_v37  ;;  %v707_v11 = vsel %vm687_vm9, %v2192_v38, 0.0 }
 0x108   : >> { %1321 = vmatpush3.bf16.msra.mxu0 %v1320_v15  ;;  %v708_v18 = vsel %vm688_vm10, %v2192_v38, 0.0  ;;  %vm743_vm11 = vcmp.eq.s32.totalorder %v2358_v54, %v2195_v39  ;;  %vm744_vm12 = vcmp.eq.s32.totalorder %v2361_v57, %v2195_v39  ;;  %vm799_vm13 = vcmp.eq.s32.totalorder %v2358_v54, %v2214_v48 }
 0x109   : >> { %1322 = vmatprep.subr.bf16.mxu0 %v1748_v6  ;;  %v723_v28 = vadd.f32 %v707_v11, %v667_v26  ;;  %v724_v29 = vadd.f32 %v708_v18, %v668_v27  ;;  %v763_v30 = vsel %vm743_vm11, %v2198_v40, 0.0  ;;  %v764_v31 = vsel %vm744_vm12, %v2198_v40, 0.0 }
 0x10a   : >> { %vm800_vm14 = vcmp.eq.s32.totalorder %v2361_v57, %v2214_v48  ;;  %v819_v32 = vsel %vm799_vm13, %v2217_v49, 0.0  ;;  %vm855_vm15 = vcmp.eq.s32.totalorder %v2358_v54, %v2230_v60  ;;  %vm856_vm0 = vcmp.eq.s32.totalorder %v2361_v57, %v2230_v60 }
 0x10b   : >> { %v779_v33 = vadd.f32 %v763_v30, %v723_v28  ;;  %v780_v34 = vadd.f32 %v764_v31, %v724_v29  ;;  %v820_v35 = vsel %vm800_vm14, %v2217_v49, 0.0  ;;  %v875_v41 = vsel %vm855_vm15, %v2233_v61, 0.0 }
 0x10c   : >> { %v876_v42 = vsel %vm856_vm0, %v2233_v61, 0.0  ;;  %v429_v43 = vadd.s32 104, %v2118_v8  ;;  %v445_v44 = vadd.s32 %v2122_v9, %v2364_v5  ;;  %v430_v54 = vadd.s32 112, %v2118_v8 }
 0x10d   : >> { %v835_v45 = vadd.f32 %v819_v32, %v779_v33  ;;  %v836_v46 = vadd.f32 %v820_v35, %v780_v34  ;;  %v431_v47 = vadd.s32 120, %v2118_v8 }
 0x10e   : >> { %v446_v57 = vadd.s32 %v2122_v9, %v429_v43  ;;  %vm465_vm1 = vcmp.eq.s32.totalorder %v445_v44, %v2142_v19  ;;  %vm521_vm2 = vcmp.eq.s32.totalorder %v445_v44, %v2149_v21  ;;  %vm577_vm3 = vcmp.eq.s32.totalorder %v445_v44, %v2155_v23 }
 0x10f   : >> { %v891_v50 = vadd.f32 %v875_v41, %v835_v45  ;;  %v892_v51 = vadd.f32 %v876_v42, %v836_v46  ;;  %v485_v52 = vsel %vm465_vm1, %v2146_v20, 0.0  ;;  %v541_v5 = vsel %vm521_vm2, %v2152_v22, 0.0 }
 0x110   : >> { %vm466_vm4 = vcmp.eq.s32.totalorder %v446_v57, %v2142_v19  ;;  %vm522_vm5 = vcmp.eq.s32.totalorder %v446_v57, %v2149_v21  ;;  %v557_v53 = vadd.f32 %v541_v5, %v485_v52  ;;  %vm578_vm6 = vcmp.eq.s32.totalorder %v446_v57, %v2155_v23 }
 0x111   : >> { %v1323_v62 = vpack.c.bf16 %v892_v51, %v891_v50  ;;  %v486_v55 = vsel %vm466_vm4, %v2146_v20, 0.0  ;;  %v542_v58 = vsel %vm522_vm5, %v2152_v22, 0.0  ;;  %v597_v59 = vsel %vm577_vm3, %v2158_v24, 0.0 }
 0x112   : >> { %v558_v56 = vadd.f32 %v542_v58, %v486_v55  ;;  %v598_v7 = vsel %vm578_vm6, %v2158_v24, 0.0  ;;  %v613_v63 = vadd.f32 %v597_v59, %v557_v53  ;;  %vm633_vm7 = vcmp.eq.s32.totalorder %v445_v44, %v2161_v25 }
 0x113   : >> { %1324 = vmatpush3.bf16.msra.mxu0 %v1323_v62  ;;  %vm634_vm8 = vcmp.eq.s32.totalorder %v446_v57, %v2161_v25  ;;  %v653_v10 = vsel %vm633_vm7, %v2186_v36, 0.0  ;;  %vm689_vm9 = vcmp.eq.s32.totalorder %v445_v44, %v2189_v37  ;;  %vm690_vm10 = vcmp.eq.s32.totalorder %v446_v57, %v2189_v37 }
 0x114   : >> { %1325 = vmatprep.subr.bf16.mxu0 %v1748_v6  ;;  %v614_v13 = vadd.f32 %v598_v7, %v558_v56  ;;  %v654_v14 = vsel %vm634_vm8, %v2186_v36, 0.0  ;;  %v669_v15 = vadd.f32 %v653_v10, %v613_v63  ;;  %v709_v16 = vsel %vm689_vm9, %v2192_v38, 0.0  ;;  %v901_v10 = vld [vmem:[%s900_s30] sm:$0xf] }
 0x115   : >> { %v710_v17 = vsel %vm690_vm10, %v2192_v38, 0.0  ;;  %vm745_vm11 = vcmp.eq.s32.totalorder %v445_v44, %v2195_v39  ;;  %vm746_vm12 = vcmp.eq.s32.totalorder %v446_v57, %v2195_v39  ;;  %vm801_vm13 = vcmp.eq.s32.totalorder %v445_v44, %v2214_v48 }
 0x116   : >> { %v670_v26 = vadd.f32 %v654_v14, %v614_v13  ;;  %v725_v27 = vadd.f32 %v709_v16, %v669_v15  ;;  %v765_v11 = vsel %vm745_vm11, %v2198_v40, 0.0  ;;  %v766_v18 = vsel %vm746_vm12, %v2198_v40, 0.0 }
 0x117   : >> { %vm802_vm14 = vcmp.eq.s32.totalorder %v446_v57, %v2214_v48  ;;  %v821_v28 = vsel %vm801_vm13, %v2217_v49, 0.0  ;;  %vm857_vm15 = vcmp.eq.s32.totalorder %v445_v44, %v2230_v60  ;;  %vm858_vm0 = vcmp.eq.s32.totalorder %v446_v57, %v2230_v60 }
 0x118   : >> { %v726_v29 = vadd.f32 %v710_v17, %v670_v26  ;;  %v781_v30 = vadd.f32 %v765_v11, %v725_v27  ;;  %v822_v31 = vsel %vm802_vm14, %v2217_v49, 0.0  ;;  %v877_v32 = vsel %vm857_vm15, %v2233_v61, 0.0 }
 0x119   : >> { %v447_v33 = vadd.s32 %v2122_v9, %v430_v54  ;;  %v448_v34 = vadd.s32 %v2122_v9, %v431_v47  ;;  %v878_v42 = vsel %vm858_vm0, %v2233_v61, 0.0  ;;  %v1751_v15 = vmov (%p409_p0), 1966171168  }
 0x11a   : >> { %v782_v35 = vadd.f32 %v766_v18, %v726_v29  ;;  %v837_v41 = vadd.f32 %v821_v28, %v781_v30  ;;  %v984_v16 = vunpack.c.l.s4 (%p409_p0), %v1751_v15  ;;  %v1026_v17 = vrot.slane (%p409_p0), %v2102_v3, %v2130_v12 }
 0x11b   : >> { %vm467_vm1 = vcmp.eq.s32.totalorder %v447_v33, %v2142_v19  ;;  %vm468_vm2 = vcmp.eq.s32.totalorder %v448_v34, %v2142_v19  ;;  %vm523_vm3 = vcmp.eq.s32.totalorder %v447_v33, %v2149_v21  ;;  %vm524_vm4 = vcmp.eq.s32.totalorder %v448_v34, %v2149_v21 }
 0x11c   : >> { %v838_v43 = vadd.f32 %v822_v31, %v782_v35  ;;  %v893_v44 = vadd.f32 %v877_v32, %v837_v41  ;;  %v487_v45 = vsel %vm467_vm1, %v2146_v20, 0.0  ;;  %v488_v46 = vsel %vm468_vm2, %v2146_v20, 0.0 }
 0x11d   : >> { %v543_v9 = vsel %vm523_vm3, %v2152_v22, 0.0  ;;  %v544_v54 = vsel %vm524_vm4, %v2152_v22, 0.0  ;;  %vm579_vm5 = vcmp.eq.s32.totalorder %v447_v33, %v2155_v23  ;;  %vm580_vm6 = vcmp.eq.s32.totalorder %v448_v34, %v2155_v23 }
 0x11e   : >> { %v894_v47 = vadd.f32 %v878_v42, %v838_v43  ;;  %v559_v19 = vadd.f32 %v543_v9, %v487_v45  ;;  %v560_v57 = vadd.f32 %v544_v54, %v488_v46  ;;  %v599_v50 = vsel %vm579_vm5, %v2158_v24, 0.0 }
 0x11f   : >> { %v600_v21 = vsel %vm580_vm6, %v2158_v24, 0.0  ;;  %vm635_vm7 = vcmp.eq.s32.totalorder %v447_v33, %v2161_v25  ;;  %vm636_vm8 = vcmp.eq.s32.totalorder %v448_v34, %v2161_v25  ;;  %vm691_vm9 = vcmp.eq.s32.totalorder %v447_v33, %v2189_v37 }
 0x120   : >> { %v1326_v20 = vpack.c.bf16 %v894_v47, %v893_v44  ;;  %v615_v51 = vadd.f32 %v599_v50, %v559_v19  ;;  %v616_v22 = vadd.f32 %v600_v21, %v560_v57  ;;  %v655_v52 = vsel %vm635_vm7, %v2186_v36, 0.0 }
 0x121   : >> { %v656_v23 = vsel %vm636_vm8, %v2186_v36, 0.0  ;;  %vm692_vm10 = vcmp.eq.s32.totalorder %v448_v34, %v2189_v37  ;;  %v711_v5 = vsel %vm691_vm9, %v2192_v38, 0.0  ;;  %vm747_vm11 = vcmp.eq.s32.totalorder %v447_v33, %v2195_v39 }
 0x122   : >> { %1327 = vmatpush3.bf16.msra.mxu0 %v1326_v20  ;;  %v671_v24 = vadd.f32 %v655_v52, %v615_v51  ;;  %v672_v53 = vadd.f32 %v656_v23, %v616_v22  ;;  %v712_v25 = vsel %vm692_vm10, %v2192_v38, 0.0  ;;  %vm748_vm12 = vcmp.eq.s32.totalorder %v448_v34, %v2195_v39 }
 0x123   : >> { %1328 = vmatprep.subr.bf16.mxu0 %v1748_v6  ;;  %v767_v62 = vsel %vm747_vm11, %v2198_v40, 0.0  ;;  %v768_v36 = vsel %vm748_vm12, %v2198_v40, 0.0  ;;  %vm803_vm13 = vcmp.eq.s32.totalorder %v447_v33, %v2214_v48  ;;  %vm804_vm14 = vcmp.eq.s32.totalorder %v448_v34, %v2214_v48 }
 0x124   : >> { %v727_v37 = vadd.f32 %v711_v5, %v671_v24  ;;  %v728_v55 = vadd.f32 %v712_v25, %v672_v53  ;;  %v823_v58 = vsel %vm803_vm13, %v2217_v49, 0.0  ;;  %v824_v59 = vsel %vm804_vm14, %v2217_v49, 0.0 }
 0x125   : >> { %vm859_vm15 = vcmp.eq.s32.totalorder %v447_v33, %v2230_v60  ;;  %vm860_vm0 = vcmp.eq.s32.totalorder %v448_v34, %v2230_v60  ;;  %vm974_vm1 = vcmask (%p409_p0), 1042432   ;;  %v985_v27 = vunpack.c.0.s8 (%p409_p0), %v984_v16 }
 0x126   : >> { %v783_v6 = vadd.f32 %v767_v62, %v727_v37  ;;  %v784_v38 = vadd.f32 %v768_v36, %v728_v55  ;;  %v879_v39 = vsel %vm859_vm15, %v2233_v61, 0.0  ;;  %v880_v40 = vsel %vm860_vm0, %v2233_v61, 0.0 }
 0x127   : > { %v988_v18 = vsub.s32 (%p409_p0), %v985_v27, %v2118_v8  ;;  %v1028_v28 = vmul.f32 (%p409_p0), %v1026_v17, %v2096_v0  ;;  %vm1034_vm2 = vcmask (%p409_p0), 1040384  }
 0x128   : >> { %v839_v48 = vadd.f32 %v823_v58, %v783_v6  ;;  %v840_v56 = vadd.f32 %v824_v59, %v784_v38 }
 0x129   : > { %v989_v1 = vrot.slane (%p409_p0), %v2096_v0, %v988_v18 }
 0x12a   : >> { %v895_v7 = vadd.f32 %v879_v39, %v839_v48  ;;  %v896_v63 = vadd.f32 %v880_v40, %v840_v56 }
 0x12b   : > { %v990_v31 = vcombine.high (%p409_p0), %v989_v1, %v989_v1 }
 0x12c   : >> { %v1329_v49 = vpack.c.bf16 %v896_v63, %v895_v7 }
 0x12d   : > { %v997_v34 = vrot.slane (%p409_p0), %v990_v31, %v988_v18 }
 0x12e   : >> { %1330 = vmatpush3.bf16.msra.mxu0 %v1329_v49 }
 0x12f   : > { %v998_v42 = vcombine.high (%p409_p0), %v997_v34, %v997_v34 }
 0x131   : >> { %1305 = vmatmul.mubr.f32.vlgmr.msra.gmra.mrb[0].mxu0 %v901_v10  ;;  %v1000_v43 = vmul.f32 (%p409_p0), %v998_v42, %v2102_v3 }
 0x201   : > { %411 = sbr.rel (!%p409_p0) target bundleno = 183 (0xb7), region = 133 }
 0x204   : >> { %v968_v60 = vpop.f32.mrb[0].mxu0 }
 0x205   : >> { %v972_v13 = vadd.f32 %v1738_v4, %v968_v60   ;;  %v1306_v14 = vpop.f32.mrb[1].mxu0 }
 0x207   : >> { %v2671_v4 = vmov %v972_v13  ;;  %v973_v61 = vmul.f32 (%p409_p0), %v972_v13, %v2096_v0  ;;  %v1010_v2 = vrot.slane (%p409_p0), %v972_v13, %v988_v18  ;;  %v1029_v33 = vsub.f32 (%p409_p0), %v1028_v28, %v972_v13 }
 0x209   : > { %v975_v26 = vsel %vm974_vm1, %v973_v61, 0.0  ;;  %v1011_v32 = vcombine.high %v1010_v2, %v1010_v2  ;;  %v1030_v8 = vmul.f32 2.0, %v1029_v33 }
 0x20a   : > { %v976_v4 = vrot.slane %v975_v26, 4 }
 0x20b   : > { %v1018_v35 = vrot.slane %v1011_v32, %v988_v18  ;;  %v1032_v46 = vrot.slane %v1030_v8, 7 }
 0x20c   : > { %v977_v11 = vadd.f32 %v976_v4, %v975_v26 }
 0x20d   : > { %v1019_v44 = vcombine.high %v1018_v35, %v1018_v35 }
 0x20e   : > { %v978_v29 = vrot.slane %v977_v11, 2 }
 0x210   : > { %v979_v30 = vadd.f32 %v978_v29, %v977_v11 }
 0x212   : > { %v980_v12 = vrot.slane %v979_v30, 1 }
 0x214   : > { %v981_v41 = vadd.f32 %v980_v12, %v979_v30 }
 0x216   : > { %v1001_v0 = vmul.f32 2.0, %v981_v41 }
 0x218   : > { %v1002_v45 = vsub.f32 %v1000_v43, %v1001_v0 }
 0x21a   : > { %v1021_v9 = vadd.f32 %v1019_v44, %v1002_v45 }
 0x21c   : > { %v1035_v3 = vsel %vm1034_vm2, %v1021_v9, %v1032_v46 }
 0x21d   : > { %1036 = vst [vmem:[%s2104_s11] sm:$0xf] %v1035_v3 }
 0x21e   : > { %1609 = shalt.err (!%p1606_p10)
}
 0x21f   : > { %s1610_s27 = scalar_lea.hbm %s2545_s23, 64  ;;  %s1614_s6 = scalar_lea.hbm %s2673_s10, 384 }
 0x220   : > { %p1611_p4 = scmp.ne.s32.totalorder %s2545_s23, %s1610_s27  ;;  %p1615_p9 = scmp.lt.u32.totalorder %s2545_s23, %s2673_s10 }
 0x221   : > { %p1616_p13 = scmp.lt.u32.totalorder %s1614_s6, %s1610_s27  ;;  %p1618_p7 = scmp.lt.u32.totalorder %s1610_s27, %s2545_s23 }
 0x222   : > { %p1612_p5 = pnand %p1611_p4, %p2674_p3 }
 0x223   : > { %p1617_p0 = por %p1616_p13, %p1615_p9 }
 0x224   : > { %p1613_p12 = pneg %p1612_p5 }
 0x225   : > { %p1619_p8 = por %p1618_p7, %p1617_p0 }
 0x227   : > { %p1620_p2 = pnand %p1619_p8, %p1613_p12 }
 0x229   : > { %1623 = shalt.err (!%p1620_p2)
}
 0x22a   : > { %1347 = dma.vmem_to_hbm [thread:$0]  (%p2674_p3), %s2547_s20, 64, %s2545_s23, %s1038_s24  }
 0x22b PF: > { %s2675_s14 = sld [smem:[#allocation20_spill]]  ;;  %s2676_s12 = sld [smem:[#allocation15_spill]] }
 0x22c   : > { %s2677_s7 = sld [smem:[#allocation24_spill]] }
 0x231   : > { %p1367_p6 = scmp.ge.s32.totalorder %s2675_s14, 2  ;;  %s1065_s21 = sand.u32 1, %s2676_s12  }
 0x232   : > { %p2678_p11 = scmp.ne.s32.totalorder %s2677_s7, 0  ;;  %s1066_s30 = scalar_lea.sflag [#allocation4], %s1065_s21 }
 0x234   : > { %p1363_p1 = pnand %p1367_p6, %p2678_p11 }
 0x236   : > { %1689 = dma.done.wait (!%p1363_p1), %s1066_s30, 64  }
 0x237   : > { %1691 = vsyncadd (!%p1363_p1), %s1066_s30, 4294967232  ;;  %s27_s28 = sadd.s32 1, %s2675_s14   ;;  %s2679_s26 = sld [smem:[#allocation16_spill]] }
 0x238   : > { %p24_p10 = scmp.ge.s32.totalorder %s27_s28, 8   ;;  %s2680_s20 = sld [smem:[#allocation25_spill]] }
 0x239   : > { %s2681_s1 = sld [smem:[#allocation17_spill]]  ;;  %s2682_s23 = sld [smem:[#allocation26_spill]] }
 0x23a   : > { %s2683_s24 = sld [smem:[#allocation18_spill]]  ;;  %s2684_s25 = sld [smem:[#allocation19_spill]] }
 0x23b   : > { %s2685_s15 = sld [smem:[#allocation21_spill]]  ;;  %s2686_s27 = sld [smem:[#allocation22_spill]] }
 0x23c   : > { %s2687_s18 = smov %s1698_s19  ;;  %s2689_s21 = smov %s1710_s22 }
 0x23d   : > { %s2688_s19 = smov %s2679_s26  ;;  %26 = sbr.rel (!%p24_p10) target bundleno = 16 (0x10), region = 144 }
 0x23f   : > { %s2690_s22 = smov %s2681_s1 }
 0x241   : > { %s2691_s26 = smov %s2685_s15 }
 0x244   :  { %1071 = vsyncpa [#allocation3], 1 }
 0x245   :  { %1073 = vsyncpa [#allocation3 + $0x1], 1 }
 0x246   :  { %1074 = vsyncpa [#allocation6], 1 }
 0x247   :  { %1076 = vsyncpa [#allocation6 + $0x1], 1 }
 0x248   :  { %1077 = vsyncpa [#allocation9], 1 }
 0x249   :  { %1079 = vsyncpa [#allocation9 + $0x1], 1 }
 0x24a   :  { %1080 = vsyncpa [#allocation4], 1 }
 0x24b   :  { %1082 = vsyncpa [#allocation4 + $0x1], 1 }

</bundles_post_ra>
